<compile_context>
chip_gen: v7x
topology: tpu7x:2x2x1
jax: 0.10.0
libtpu: 0.0.40
codegen_flags: <defaults>
</compile_context>

<pallas_src>
import functools

import jax
import jax.numpy as jnp
from jax import lax
from jax.experimental import pallas as pl
from jax.experimental.pallas import tpu as pltpu


def _round_up(n, m):
    return ((n + m - 1) // m) * m


def _choose_time_chunk(T, max_chunk=32):
    """Largest divisor of T that is <= max_chunk (keeps T % Tc == 0)."""
    best = 1
    for c in range(1, min(T, max_chunk) + 1):
        if T % c == 0:
            best = c
    return best


def rnn_chunk_kernel(x_ref, h0_ref, w_xh_ref, b_h_ref, w_ho_ref, b_o_ref,
                     out_ref, hout_ref, xh_ref, *, i_pad, t_chunk):
    """One grid step == one (batch_tile, time_chunk).

    xh_ref is a persistent bf16 VMEM scratch of shape (b_tile, i_pad + h_pad);
    its right half carries the hidden state across timesteps and time chunks.
    """
    c = pl.program_id(1)            # time-chunk index (sequential / "arbitrary")

    @pl.when(c == 0)
    def _():                        # (re)load initial hidden for this batch tile
        xh_ref[:, i_pad:] = h0_ref[...].astype(jnp.bfloat16)

    def step(t, carry):
        # hidden = tanh(i2h(x_t) + h2h(h_t)) as ONE fused bf16 MXU matmul.
        xh_ref[:, :i_pad] = x_ref[t]                 # x_t (already bf16)
        pre = (jnp.dot(xh_ref[...], w_xh_ref[...],
                       preferred_element_type=jnp.float32) + b_h_ref[...])
        h_new = jnp.tanh(pre)                        # f32 elementwise (v5e-safe)
        h_bf16 = h_new.astype(jnp.bfloat16)
        xh_ref[:, i_pad:] = h_bf16                   # carry for step t+1

        # output = log_softmax(h2o(hidden)); padded classes carry a -1e30 bias
        # (weights on padded columns are zero), so no per-step masking is needed.
        logits = (jnp.dot(h_bf16, w_ho_ref[...],
                          preferred_element_type=jnp.float32) + b_o_ref[...])
        m = jnp.max(logits, axis=1, keepdims=True)
        shifted = logits - m
        lse = jnp.log(jnp.sum(jnp.exp(shifted), axis=1, keepdims=True))
        out_ref[t] = (shifted - lse).astype(out_ref.dtype)
        return carry

    lax.fori_loop(0, t_chunk, step, 0, unroll=True)

    @pl.when(c == pl.num_programs(1) - 1)
    def _():                        # final hidden written once per batch tile
        hout_ref[...] = xh_ref[:, i_pad:].astype(jnp.float32)


def init_params(key, input_size, hidden_size, output_size):
    """PyTorch-style nn.Linear params: weights are (out_features, in_features)."""
    ks = jax.random.split(key, 6)

    def lin(kw, kb, out_f, in_f):
        bound = 1.0 / jnp.sqrt(in_f)
        w = jax.random.uniform(kw, (out_f, in_f), jnp.float32, -bound, bound)
        b = jax.random.uniform(kb, (out_f,), jnp.float32, -bound, bound)
        return w, b

    w_ih, b_ih = lin(ks[0], ks[1], hidden_size, input_size)
    w_hh, b_hh = lin(ks[2], ks[3], hidden_size, hidden_size)
    w_ho, b_ho = lin(ks[4], ks[5], output_size, hidden_size)
    return (w_ih, b_ih, w_hh, b_hh, w_ho, b_ho)


def pack_params(raw_params):
    """One-time transform: transpose to (in,out), fuse i2h+h2h, pad to 128 lanes,
    bake the padded-class mask into the output bias, cast weights to bf16."""
    w_ih, b_ih, w_hh, b_hh, w_ho, b_ho = raw_params
    hidden_size, input_size = w_ih.shape
    output_size = w_ho.shape[0]

    i_pad = _round_up(input_size, 128)
    h_pad = _round_up(hidden_size, 128)
    o_pad = _round_up(output_size, 128)

    # Stacked [W_ih^T ; W_hh^T] -> (i_pad + h_pad, h_pad), zero padded.
    w_xh = jnp.zeros((i_pad + h_pad, h_pad), jnp.float32)
    w_xh = w_xh.at[:input_size, :hidden_size].set(w_ih.T)
    w_xh = w_xh.at[i_pad:i_pad + hidden_size, :hidden_size].set(w_hh.T)
    b_h = jnp.zeros((1, h_pad), jnp.float32).at[0, :hidden_size].set(b_ih + b_hh)

    w_ho_p = jnp.zeros((h_pad, o_pad), jnp.float32)
    w_ho_p = w_ho_p.at[:hidden_size, :output_size].set(w_ho.T)
    # Padded logits = 0 (zero weight cols) + (-1e30) -> effectively -inf for the
    # softmax, with zero per-step masking cost and no inf/NaN in padded lanes.
    b_o = jnp.full((1, o_pad), -1e30, jnp.float32).at[0, :output_size].set(b_ho)

    packed = (w_xh.astype(jnp.bfloat16), b_h,
              w_ho_p.astype(jnp.bfloat16), b_o)
    meta = dict(input_size=input_size, hidden_size=hidden_size,
                output_size=output_size, i_pad=i_pad, h_pad=h_pad, o_pad=o_pad)
    return packed, meta


def rnn_forward_sequence(xs, h0, packed_params, meta):
    """Run T fused RNN steps in ONE pallas_call.

    xs: (T, B, input_size), h0: (B, hidden_size).
    Returns (log_softmax outputs (T, B, output_size), final hidden (B, hidden_size)).
    """
    w_xh, b_h, w_ho, b_o = packed_params
    I, H, O = meta["input_size"], meta["hidden_size"], meta["output_size"]
    i_pad, h_pad, o_pad = meta["i_pad"], meta["h_pad"], meta["o_pad"]
    T, B, _ = xs.shape

    # Batch padding: multiple of 16 (bf16 sublane packing). Tiles of up to 128
    # rows; extra tiles become a "parallel" grid axis (both v7x TensorCores).
    b_pad = _round_up(max(B, 1), 16)
    if b_pad > 128:
        b_tile = 128
        b_pad = _round_up(b_pad, b_tile)
    else:
        b_tile = b_pad
    n_btiles = b_pad // b_tile

    t_chunk = _choose_time_chunk(T)
    n_chunks = T // t_chunk

    x_p = (jnp.zeros((T, b_pad, i_pad), jnp.float32)
           .at[:, :B, :I].set(xs).astype(jnp.bfloat16))
    h0_p = jnp.zeros((b_pad, h_pad), jnp.float32).at[:B, :H].set(h0)

    kernel = functools.partial(rnn_chunk_kernel, i_pad=i_pad, t_chunk=t_chunk)

    flops = 2 * T * b_pad * ((i_pad + h_pad) * h_pad + h_pad * o_pad)
    transc = T * b_pad * (h_pad + o_pad)                       # tanh + exp
    bytes_acc = (2 * (x_p.size + w_xh.size + w_ho.size)        # bf16 inputs
                 + 4 * (b_h.size + b_o.size + h0_p.size)
                 + 4 * (T * b_pad * o_pad + b_pad * h_pad))    # f32 outputs

    out_p, h_p = pl.pallas_call(
        kernel,
        grid=(n_btiles, n_chunks),
        in_specs=[
            pl.BlockSpec((t_chunk, b_tile, i_pad), lambda b, c: (c, b, 0)),  # x stream
            pl.BlockSpec((b_tile, h_pad), lambda b, c: (b, 0)),              # h0
            pl.BlockSpec((i_pad + h_pad, h_pad), lambda b, c: (0, 0)),       # fused W (resident)
            pl.BlockSpec((1, h_pad), lambda b, c: (0, 0)),                   # fused bias
            pl.BlockSpec((h_pad, o_pad), lambda b, c: (0, 0)),               # W_ho (resident)
            pl.BlockSpec((1, o_pad), lambda b, c: (0, 0)),                   # b_o (mask baked in)
        ],
        out_specs=(
            pl.BlockSpec((t_chunk, b_tile, o_pad), lambda b, c: (c, b, 0)),  # per-step log-probs
            pl.BlockSpec((b_tile, h_pad), lambda b, c: (b, 0)),              # final hidden
        ),
        out_shape=(
            jax.ShapeDtypeStruct((T, b_pad, o_pad), jnp.float32),
            jax.ShapeDtypeStruct((b_pad, h_pad), jnp.float32),
        ),
        scratch_shapes=[pltpu.VMEM((b_tile, i_pad + h_pad), jnp.bfloat16)],  # [x|h] carry
        compiler_params=pltpu.CompilerParams(
            dimension_semantics=("parallel", "arbitrary")),
        cost_estimate=pl.CostEstimate(flops=flops, transcendentals=transc,
                                      bytes_accessed=bytes_acc),
    )(x_p, h0_p, w_xh, b_h, w_ho, b_o)

    return out_p[:, :B, :O], h_p[:B, :H]


def rnn_forward(x, h, packed_params, meta):
    """Single-step API matching the PyTorch module's forward(input, hidden)."""
    out_seq, h_new = rnn_forward_sequence(x[None], h, packed_params, meta)
    return out_seq[0], h_new


if __name__ == "__main__":
    key = jax.random.PRNGKey(0)
    k_params, k_x = jax.random.split(key, 2)

    batch = 2
    input_size = 16
    hidden_size = 32
    output_size = 8
    seq_len = 8

    raw_params = init_params(k_params, input_size, hidden_size, output_size)
    packed_params, meta = pack_params(raw_params)

    xs = jax.random.normal(k_x, (seq_len, batch, input_size), jnp.float32)
    h0 = jnp.zeros((batch, hidden_size), jnp.float32)   # mirrors initHidden per row

    # Fused-sequence kernel (one pallas_call for all timesteps).
    outs, h_final = rnn_forward_sequence(xs, h0, packed_params, meta)
    # Single-step API (module.forward semantics).
    out_step, h_step = rnn_forward(xs[0], h0, packed_params, meta)
    jax.block_until_ready((outs, h_final, out_step, h_step))

    # Plain-JAX f32 reference: step-by-step PyTorch forward semantics.
    w_ih, b_ih, w_hh, b_hh, w_ho, b_ho = raw_params
    h_ref = h0
    outs_ref = []
    for t in range(seq_len):
        h_ref = jnp.tanh(xs[t] @ w_ih.T + b_ih + h_ref @ w_hh.T + b_hh)
        logits = h_ref @ w_ho.T + b_ho
        outs_ref.append(jax.nn.log_softmax(logits, axis=1))
    outs_ref = jnp.stack(outs_ref)
    h1_ref = jnp.tanh(xs[0] @ w_ih.T + b_ih + h0 @ w_hh.T + b_hh)

    # bf16 MXU inputs -> tolerances loosened vs. the pure-f32 reference.
    assert jnp.allclose(outs, outs_ref, atol=5e-2), "sequence output mismatch"
    assert jnp.allclose(h_final, h_ref, atol=3e-2), "final hidden mismatch"
    assert jnp.allclose(out_step, outs_ref[0], atol=5e-2), "single-step output mismatch"
    assert jnp.allclose(h_step, h1_ref, atol=3e-2), "single-step hidden mismatch"

    print("KERNEL_OK")
</pallas_src>

<mosaic_0001>
module attributes {stable_mosaic.version = 11 : i64} {
  func.func @rnn_chunk_kernel(%arg0: i32, %arg1: i32, %arg2: memref<8x16x128xbf16, #tpu.memory_space<vmem>>, %arg3: memref<16x128xf32, #tpu.memory_space<vmem>>, %arg4: memref<256x128xbf16, #tpu.memory_space<vmem>>, %arg5: memref<1x128xf32, #tpu.memory_space<vmem>>, %arg6: memref<128x128xbf16, #tpu.memory_space<vmem>>, %arg7: memref<1x128xf32, #tpu.memory_space<vmem>>, %arg8: memref<8x16x128xf32, #tpu.memory_space<vmem>>, %arg9: memref<16x128xf32, #tpu.memory_space<vmem>>, %arg10: memref<16x256xbf16, #tpu.memory_space<vmem>>) attributes {dimension_semantics = [#tpu.dimension_semantics<parallel>, #tpu.dimension_semantics<arbitrary>], iteration_bounds = array<i64: 1, 1>, scalar_prefetch = 0 : i64, scratch_operands = 1 : i64, tpu.core_type = #tpu.core_type<tc>, window_params = [{transform_indices = @transform_0, window_bounds = array<i64: 8, 16, 128>}, {transform_indices = @transform_1, window_bounds = array<i64: 16, 128>}, {pipeline_mode = #tpu.pipeline_mode<synchronous>, transform_indices = @transform_2, window_bounds = array<i64: 256, 128>}, {pipeline_mode = #tpu.pipeline_mode<synchronous>, transform_indices = @transform_3, window_bounds = array<i64: 1, 128>}, {pipeline_mode = #tpu.pipeline_mode<synchronous>, transform_indices = @transform_4, window_bounds = array<i64: 128, 128>}, {pipeline_mode = #tpu.pipeline_mode<synchronous>, transform_indices = @transform_5, window_bounds = array<i64: 1, 128>}, {transform_indices = @transform_6, window_bounds = array<i64: 8, 16, 128>}, {transform_indices = @transform_7, window_bounds = array<i64: 16, 128>}]} {
    %c0_i32 = arith.constant 0 : i32
    %0 = arith.cmpi eq, %arg1, %c0_i32 : i32
    %1 = arith.extui %0 : i1 to i32
    %c0_i32_0 = arith.constant 0 : i32
    %2 = arith.cmpi ne, %1, %c0_i32_0 : i32
    scf.if %2 {
      %c0_177 = arith.constant 0 : index
      %c0_178 = arith.constant 0 : index
      %262 = vector.load %arg3[%c0_177, %c0_178] : memref<16x128xf32, #tpu.memory_space<vmem>>, vector<16x128xf32>
      %263 = arith.truncf %262 : vector<16x128xf32> to vector<16x128xbf16>
      %c0_179 = arith.constant 0 : index
      %c128_180 = arith.constant 128 : index
      %264 = vector.load %arg10[%c0_179, %c128_180] : memref<16x256xbf16, #tpu.memory_space<vmem>>, vector<16x128xbf16>
      tpu.vector_store %arg10[%c0_179, %c128_180], %263 {strides = array<i32>} : memref<16x256xbf16, #tpu.memory_space<vmem>>, vector<16x128xbf16>,
    } else {
    }
    %c0_i32_1 = arith.constant 0 : i32
    %3 = arith.index_cast %c0_i32_1 : i32 to index
    %c0 = arith.constant 0 : index
    %c0_2 = arith.constant 0 : index
    %4 = vector.load %arg2[%3, %c0, %c0_2] : memref<8x16x128xbf16, #tpu.memory_space<vmem>>, vector<1x16x128xbf16>
    %5 = vector.shape_cast %4 : vector<1x16x128xbf16> to vector<16x128xbf16>
    %c0_3 = arith.constant 0 : index
    %c0_4 = arith.constant 0 : index
    %6 = vector.load %arg10[%c0_3, %c0_4] : memref<16x256xbf16, #tpu.memory_space<vmem>>, vector<16x128xbf16>
    tpu.vector_store %arg10[%c0_3, %c0_4], %5 {strides = array<i32>} : memref<16x256xbf16, #tpu.memory_space<vmem>>, vector<16x128xbf16>,
    %c0_5 = arith.constant 0 : index
    %c0_6 = arith.constant 0 : index
    %7 = vector.load %arg10[%c0_5, %c0_6] : memref<16x256xbf16, #tpu.memory_space<vmem>>, vector<16x256xbf16>
    %c0_7 = arith.constant 0 : index
    %c0_8 = arith.constant 0 : index
    %8 = vector.load %arg4[%c0_7, %c0_8] : memref<256x128xbf16, #tpu.memory_space<vmem>>, vector<256x128xbf16>
    %cst = arith.constant dense<0.000000e+00> : vector<16x128xf32>
    %9 = tpu.matmul %7, %8, %cst {dimension_numbers = #tpu.dot_dimension_numbers<[1], [0], [0], [1], [0, 0, 1, 1], [], []>} : vector<16x256xbf16>, vector<256x128xbf16>, vector<16x128xf32> -> vector<16x128xf32>
    %c0_9 = arith.constant 0 : index
    %c0_10 = arith.constant 0 : index
    %10 = vector.load %arg5[%c0_9, %c0_10] : memref<1x128xf32, #tpu.memory_space<vmem>>, vector<1x128xf32>
    %11 = vector.broadcast %10 : vector<1x128xf32> to vector<16x128xf32>
    %12 = arith.addf %9, %11 : vector<16x128xf32>
    %13 = math.tanh %12 : vector<16x128xf32>
    %14 = arith.truncf %13 : vector<16x128xf32> to vector<16x128xbf16>
    %c0_11 = arith.constant 0 : index
    %c128 = arith.constant 128 : index
    %15 = vector.load %arg10[%c0_11, %c128] : memref<16x256xbf16, #tpu.memory_space<vmem>>, vector<16x128xbf16>
    tpu.vector_store %arg10[%c0_11, %c128], %14 {strides = array<i32>} : memref<16x256xbf16, #tpu.memory_space<vmem>>, vector<16x128xbf16>,
    %c0_12 = arith.constant 0 : index
    %c0_13 = arith.constant 0 : index
    %16 = vector.load %arg6[%c0_12, %c0_13] : memref<128x128xbf16, #tpu.memory_space<vmem>>, vector<128x128xbf16>
    %cst_14 = arith.constant dense<0.000000e+00> : vector<16x128xf32>
    %17 = tpu.matmul %14, %16, %cst_14 {dimension_numbers = #tpu.dot_dimension_numbers<[1], [0], [0], [1], [0, 0, 1, 1], [], []>} : vector<16x128xbf16>, vector<128x128xbf16>, vector<16x128xf32> -> vector<16x128xf32>
    %c0_15 = arith.constant 0 : index
    %c0_16 = arith.constant 0 : index
    %18 = vector.load %arg7[%c0_15, %c0_16] : memref<1x128xf32, #tpu.memory_space<vmem>>, vector<1x128xf32>
    %19 = vector.broadcast %18 : vector<1x128xf32> to vector<16x128xf32>
    %20 = arith.addf %17, %19 : vector<16x128xf32>
    %cst_17 = arith.constant dense<0xFF800000> : vector<16xf32>
    %21 = vector.multi_reduction <maximumf>, %20, %cst_17 [1] : vector<16x128xf32> to vector<16xf32>
    %22 = vector.shape_cast %21 : vector<16xf32> to vector<16x1xf32>
    %23 = vector.broadcast %22 : vector<16x1xf32> to vector<16x128xf32>
    %24 = arith.subf %20, %23 : vector<16x128xf32>
    %25 = math.exp %24 : vector<16x128xf32>
    %cst_18 = arith.constant dense<0.000000e+00> : vector<16xf32>
    %26 = vector.multi_reduction <add>, %25, %cst_18 [1] : vector<16x128xf32> to vector<16xf32>
    %27 = vector.shape_cast %26 : vector<16xf32> to vector<16x1xf32>
    %28 = math.log %27 : vector<16x1xf32>
    %29 = vector.broadcast %28 : vector<16x1xf32> to vector<16x128xf32>
    %30 = arith.subf %24, %29 : vector<16x128xf32>
    %31 = arith.index_cast %c0_i32_1 : i32 to index
    %c0_19 = arith.constant 0 : index
    %c0_20 = arith.constant 0 : index
    %32 = vector.load %arg8[%31, %c0_19, %c0_20] : memref<8x16x128xf32, #tpu.memory_space<vmem>>, vector<1x16x128xf32>
    %33 = vector.shape_cast %32 : vector<1x16x128xf32> to vector<16x128xf32>
    %34 = vector.shape_cast %30 : vector<16x128xf32> to vector<1x16x128xf32>
    tpu.vector_store %arg8[%31, %c0_19, %c0_20], %34 {strides = array<i32>} : memref<8x16x128xf32, #tpu.memory_space<vmem>>, vector<1x16x128xf32>,
    %c1_i32 = arith.constant 1 : i32
    %35 = arith.index_cast %c1_i32 : i32 to index
    %c0_21 = arith.constant 0 : index
    %c0_22 = arith.constant 0 : index
    %36 = vector.load %arg2[%35, %c0_21, %c0_22] : memref<8x16x128xbf16, #tpu.memory_space<vmem>>, vector<1x16x128xbf16>
    %37 = vector.shape_cast %36 : vector<1x16x128xbf16> to vector<16x128xbf16>
    %c0_23 = arith.constant 0 : index
    %c0_24 = arith.constant 0 : index
    %38 = vector.load %arg10[%c0_23, %c0_24] : memref<16x256xbf16, #tpu.memory_space<vmem>>, vector<16x128xbf16>
    tpu.vector_store %arg10[%c0_23, %c0_24], %37 {strides = array<i32>} : memref<16x256xbf16, #tpu.memory_space<vmem>>, vector<16x128xbf16>,
    %c0_25 = arith.constant 0 : index
    %c0_26 = arith.constant 0 : index
    %39 = vector.load %arg10[%c0_25, %c0_26] : memref<16x256xbf16, #tpu.memory_space<vmem>>, vector<16x256xbf16>
    %c0_27 = arith.constant 0 : index
    %c0_28 = arith.constant 0 : index
    %40 = vector.load %arg4[%c0_27, %c0_28] : memref<256x128xbf16, #tpu.memory_space<vmem>>, vector<256x128xbf16>
    %cst_29 = arith.constant dense<0.000000e+00> : vector<16x128xf32>
    %41 = tpu.matmul %39, %40, %cst_29 {dimension_numbers = #tpu.dot_dimension_numbers<[1], [0], [0], [1], [0, 0, 1, 1], [], []>} : vector<16x256xbf16>, vector<256x128xbf16>, vector<16x128xf32> -> vector<16x128xf32>
    %c0_30 = arith.constant 0 : index
    %c0_31 = arith.constant 0 : index
    %42 = vector.load %arg5[%c0_30, %c0_31] : memref<1x128xf32, #tpu.memory_space<vmem>>, vector<1x128xf32>
    %43 = vector.broadcast %42 : vector<1x128xf32> to vector<16x128xf32>
    %44 = arith.addf %41, %43 : vector<16x128xf32>
    %45 = math.tanh %44 : vector<16x128xf32>
    %46 = arith.truncf %45 : vector<16x128xf32> to vector<16x128xbf16>
    %c0_32 = arith.constant 0 : index
    %c128_33 = arith.constant 128 : index
    %47 = vector.load %arg10[%c0_32, %c128_33] : memref<16x256xbf16, #tpu.memory_space<vmem>>, vector<16x128xbf16>
    tpu.vector_store %arg10[%c0_32, %c128_33], %46 {strides = array<i32>} : memref<16x256xbf16, #tpu.memory_space<vmem>>, vector<16x128xbf16>,
    %c0_34 = arith.constant 0 : index
    %c0_35 = arith.constant 0 : index
    %48 = vector.load %arg6[%c0_34, %c0_35] : memref<128x128xbf16, #tpu.memory_space<vmem>>, vector<128x128xbf16>
    %cst_36 = arith.constant dense<0.000000e+00> : vector<16x128xf32>
    %49 = tpu.matmul %46, %48, %cst_36 {dimension_numbers = #tpu.dot_dimension_numbers<[1], [0], [0], [1], [0, 0, 1, 1], [], []>} : vector<16x128xbf16>, vector<128x128xbf16>, vector<16x128xf32> -> vector<16x128xf32>
    %c0_37 = arith.constant 0 : index
    %c0_38 = arith.constant 0 : index
    %50 = vector.load %arg7[%c0_37, %c0_38] : memref<1x128xf32, #tpu.memory_space<vmem>>, vector<1x128xf32>
    %51 = vector.broadcast %50 : vector<1x128xf32> to vector<16x128xf32>
    %52 = arith.addf %49, %51 : vector<16x128xf32>
    %cst_39 = arith.constant dense<0xFF800000> : vector<16xf32>
    %53 = vector.multi_reduction <maximumf>, %52, %cst_39 [1] : vector<16x128xf32> to vector<16xf32>
    %54 = vector.shape_cast %53 : vector<16xf32> to vector<16x1xf32>
    %55 = vector.broadcast %54 : vector<16x1xf32> to vector<16x128xf32>
    %56 = arith.subf %52, %55 : vector<16x128xf32>
    %57 = math.exp %56 : vector<16x128xf32>
    %cst_40 = arith.constant dense<0.000000e+00> : vector<16xf32>
    %58 = vector.multi_reduction <add>, %57, %cst_40 [1] : vector<16x128xf32> to vector<16xf32>
    %59 = vector.shape_cast %58 : vector<16xf32> to vector<16x1xf32>
    %60 = math.log %59 : vector<16x1xf32>
    %61 = vector.broadcast %60 : vector<16x1xf32> to vector<16x128xf32>
    %62 = arith.subf %56, %61 : vector<16x128xf32>
    %63 = arith.index_cast %c1_i32 : i32 to index
    %c0_41 = arith.constant 0 : index
    %c0_42 = arith.constant 0 : index
    %64 = vector.load %arg8[%63, %c0_41, %c0_42] : memref<8x16x128xf32, #tpu.memory_space<vmem>>, vector<1x16x128xf32>
    %65 = vector.shape_cast %64 : vector<1x16x128xf32> to vector<16x128xf32>
    %66 = vector.shape_cast %62 : vector<16x128xf32> to vector<1x16x128xf32>
    tpu.vector_store %arg8[%63, %c0_41, %c0_42], %66 {strides = array<i32>} : memref<8x16x128xf32, #tpu.memory_space<vmem>>, vector<1x16x128xf32>,
    %c2_i32 = arith.constant 2 : i32
    %67 = arith.index_cast %c2_i32 : i32 to index
    %c0_43 = arith.constant 0 : index
    %c0_44 = arith.constant 0 : index
    %68 = vector.load %arg2[%67, %c0_43, %c0_44] : memref<8x16x128xbf16, #tpu.memory_space<vmem>>, vector<1x16x128xbf16>
    %69 = vector.shape_cast %68 : vector<1x16x128xbf16> to vector<16x128xbf16>
    %c0_45 = arith.constant 0 : index
    %c0_46 = arith.constant 0 : index
    %70 = vector.load %arg10[%c0_45, %c0_46] : memref<16x256xbf16, #tpu.memory_space<vmem>>, vector<16x128xbf16>
    tpu.vector_store %arg10[%c0_45, %c0_46], %69 {strides = array<i32>} : memref<16x256xbf16, #tpu.memory_space<vmem>>, vector<16x128xbf16>,
    %c0_47 = arith.constant 0 : index
    %c0_48 = arith.constant 0 : index
    %71 = vector.load %arg10[%c0_47, %c0_48] : memref<16x256xbf16, #tpu.memory_space<vmem>>, vector<16x256xbf16>
    %c0_49 = arith.constant 0 : index
    %c0_50 = arith.constant 0 : index
    %72 = vector.load %arg4[%c0_49, %c0_50] : memref<256x128xbf16, #tpu.memory_space<vmem>>, vector<256x128xbf16>
    %cst_51 = arith.constant dense<0.000000e+00> : vector<16x128xf32>
    %73 = tpu.matmul %71, %72, %cst_51 {dimension_numbers = #tpu.dot_dimension_numbers<[1], [0], [0], [1], [0, 0, 1, 1], [], []>} : vector<16x256xbf16>, vector<256x128xbf16>, vector<16x128xf32> -> vector<16x128xf32>
    %c0_52 = arith.constant 0 : index
    %c0_53 = arith.constant 0 : index
    %74 = vector.load %arg5[%c0_52, %c0_53] : memref<1x128xf32, #tpu.memory_space<vmem>>, vector<1x128xf32>
    %75 = vector.broadcast %74 : vector<1x128xf32> to vector<16x128xf32>
    %76 = arith.addf %73, %75 : vector<16x128xf32>
    %77 = math.tanh %76 : vector<16x128xf32>
    %78 = arith.truncf %77 : vector<16x128xf32> to vector<16x128xbf16>
    %c0_54 = arith.constant 0 : index
    %c128_55 = arith.constant 128 : index
    %79 = vector.load %arg10[%c0_54, %c128_55] : memref<16x256xbf16, #tpu.memory_space<vmem>>, vector<16x128xbf16>
    tpu.vector_store %arg10[%c0_54, %c128_55], %78 {strides = array<i32>} : memref<16x256xbf16, #tpu.memory_space<vmem>>, vector<16x128xbf16>,
    %c0_56 = arith.constant 0 : index
    %c0_57 = arith.constant 0 : index
    %80 = vector.load %arg6[%c0_56, %c0_57] : memref<128x128xbf16, #tpu.memory_space<vmem>>, vector<128x128xbf16>
    %cst_58 = arith.constant dense<0.000000e+00> : vector<16x128xf32>
    %81 = tpu.matmul %78, %80, %cst_58 {dimension_numbers = #tpu.dot_dimension_numbers<[1], [0], [0], [1], [0, 0, 1, 1], [], []>} : vector<16x128xbf16>, vector<128x128xbf16>, vector<16x128xf32> -> vector<16x128xf32>
    %c0_59 = arith.constant 0 : index
    %c0_60 = arith.constant 0 : index
    %82 = vector.load %arg7[%c0_59, %c0_60] : memref<1x128xf32, #tpu.memory_space<vmem>>, vector<1x128xf32>
    %83 = vector.broadcast %82 : vector<1x128xf32> to vector<16x128xf32>
    %84 = arith.addf %81, %83 : vector<16x128xf32>
    %cst_61 = arith.constant dense<0xFF800000> : vector<16xf32>
    %85 = vector.multi_reduction <maximumf>, %84, %cst_61 [1] : vector<16x128xf32> to vector<16xf32>
    %86 = vector.shape_cast %85 : vector<16xf32> to vector<16x1xf32>
    %87 = vector.broadcast %86 : vector<16x1xf32> to vector<16x128xf32>
    %88 = arith.subf %84, %87 : vector<16x128xf32>
    %89 = math.exp %88 : vector<16x128xf32>
    %cst_62 = arith.constant dense<0.000000e+00> : vector<16xf32>
    %90 = vector.multi_reduction <add>, %89, %cst_62 [1] : vector<16x128xf32> to vector<16xf32>
    %91 = vector.shape_cast %90 : vector<16xf32> to vector<16x1xf32>
    %92 = math.log %91 : vector<16x1xf32>
    %93 = vector.broadcast %92 : vector<16x1xf32> to vector<16x128xf32>
    %94 = arith.subf %88, %93 : vector<16x128xf32>
    %95 = arith.index_cast %c2_i32 : i32 to index
    %c0_63 = arith.constant 0 : index
    %c0_64 = arith.constant 0 : index
    %96 = vector.load %arg8[%95, %c0_63, %c0_64] : memref<8x16x128xf32, #tpu.memory_space<vmem>>, vector<1x16x128xf32>
    %97 = vector.shape_cast %96 : vector<1x16x128xf32> to vector<16x128xf32>
    %98 = vector.shape_cast %94 : vector<16x128xf32> to vector<1x16x128xf32>
    tpu.vector_store %arg8[%95, %c0_63, %c0_64], %98 {strides = array<i32>} : memref<8x16x128xf32, #tpu.memory_space<vmem>>, vector<1x16x128xf32>,
    %c3_i32 = arith.constant 3 : i32
    %99 = arith.index_cast %c3_i32 : i32 to index
    %c0_65 = arith.constant 0 : index
    %c0_66 = arith.constant 0 : index
    %100 = vector.load %arg2[%99, %c0_65, %c0_66] : memref<8x16x128xbf16, #tpu.memory_space<vmem>>, vector<1x16x128xbf16>
    %101 = vector.shape_cast %100 : vector<1x16x128xbf16> to vector<16x128xbf16>
    %c0_67 = arith.constant 0 : index
    %c0_68 = arith.constant 0 : index
    %102 = vector.load %arg10[%c0_67, %c0_68] : memref<16x256xbf16, #tpu.memory_space<vmem>>, vector<16x128xbf16>
    tpu.vector_store %arg10[%c0_67, %c0_68], %101 {strides = array<i32>} : memref<16x256xbf16, #tpu.memory_space<vmem>>, vector<16x128xbf16>,
    %c0_69 = arith.constant 0 : index
    %c0_70 = arith.constant 0 : index
    %103 = vector.load %arg10[%c0_69, %c0_70] : memref<16x256xbf16, #tpu.memory_space<vmem>>, vector<16x256xbf16>
    %c0_71 = arith.constant 0 : index
    %c0_72 = arith.constant 0 : index
    %104 = vector.load %arg4[%c0_71, %c0_72] : memref<256x128xbf16, #tpu.memory_space<vmem>>, vector<256x128xbf16>
    %cst_73 = arith.constant dense<0.000000e+00> : vector<16x128xf32>
    %105 = tpu.matmul %103, %104, %cst_73 {dimension_numbers = #tpu.dot_dimension_numbers<[1], [0], [0], [1], [0, 0, 1, 1], [], []>} : vector<16x256xbf16>, vector<256x128xbf16>, vector<16x128xf32> -> vector<16x128xf32>
    %c0_74 = arith.constant 0 : index
    %c0_75 = arith.constant 0 : index
    %106 = vector.load %arg5[%c0_74, %c0_75] : memref<1x128xf32, #tpu.memory_space<vmem>>, vector<1x128xf32>
    %107 = vector.broadcast %106 : vector<1x128xf32> to vector<16x128xf32>
    %108 = arith.addf %105, %107 : vector<16x128xf32>
    %109 = math.tanh %108 : vector<16x128xf32>
    %110 = arith.truncf %109 : vector<16x128xf32> to vector<16x128xbf16>
    %c0_76 = arith.constant 0 : index
    %c128_77 = arith.constant 128 : index
    %111 = vector.load %arg10[%c0_76, %c128_77] : memref<16x256xbf16, #tpu.memory_space<vmem>>, vector<16x128xbf16>
    tpu.vector_store %arg10[%c0_76, %c128_77], %110 {strides = array<i32>} : memref<16x256xbf16, #tpu.memory_space<vmem>>, vector<16x128xbf16>,
    %c0_78 = arith.constant 0 : index
    %c0_79 = arith.constant 0 : index
    %112 = vector.load %arg6[%c0_78, %c0_79] : memref<128x128xbf16, #tpu.memory_space<vmem>>, vector<128x128xbf16>
    %cst_80 = arith.constant dense<0.000000e+00> : vector<16x128xf32>
    %113 = tpu.matmul %110, %112, %cst_80 {dimension_numbers = #tpu.dot_dimension_numbers<[1], [0], [0], [1], [0, 0, 1, 1], [], []>} : vector<16x128xbf16>, vector<128x128xbf16>, vector<16x128xf32> -> vector<16x128xf32>
    %c0_81 = arith.constant 0 : index
    %c0_82 = arith.constant 0 : index
    %114 = vector.load %arg7[%c0_81, %c0_82] : memref<1x128xf32, #tpu.memory_space<vmem>>, vector<1x128xf32>
    %115 = vector.broadcast %114 : vector<1x128xf32> to vector<16x128xf32>
    %116 = arith.addf %113, %115 : vector<16x128xf32>
    %cst_83 = arith.constant dense<0xFF800000> : vector<16xf32>
    %117 = vector.multi_reduction <maximumf>, %116, %cst_83 [1] : vector<16x128xf32> to vector<16xf32>
    %118 = vector.shape_cast %117 : vector<16xf32> to vector<16x1xf32>
    %119 = vector.broadcast %118 : vector<16x1xf32> to vector<16x128xf32>
    %120 = arith.subf %116, %119 : vector<16x128xf32>
    %121 = math.exp %120 : vector<16x128xf32>
    %cst_84 = arith.constant dense<0.000000e+00> : vector<16xf32>
    %122 = vector.multi_reduction <add>, %121, %cst_84 [1] : vector<16x128xf32> to vector<16xf32>
    %123 = vector.shape_cast %122 : vector<16xf32> to vector<16x1xf32>
    %124 = math.log %123 : vector<16x1xf32>
    %125 = vector.broadcast %124 : vector<16x1xf32> to vector<16x128xf32>
    %126 = arith.subf %120, %125 : vector<16x128xf32>
    %127 = arith.index_cast %c3_i32 : i32 to index
    %c0_85 = arith.constant 0 : index
    %c0_86 = arith.constant 0 : index
    %128 = vector.load %arg8[%127, %c0_85, %c0_86] : memref<8x16x128xf32, #tpu.memory_space<vmem>>, vector<1x16x128xf32>
    %129 = vector.shape_cast %128 : vector<1x16x128xf32> to vector<16x128xf32>
    %130 = vector.shape_cast %126 : vector<16x128xf32> to vector<1x16x128xf32>
    tpu.vector_store %arg8[%127, %c0_85, %c0_86], %130 {strides = array<i32>} : memref<8x16x128xf32, #tpu.memory_space<vmem>>, vector<1x16x128xf32>,
    %c4_i32 = arith.constant 4 : i32
    %131 = arith.index_cast %c4_i32 : i32 to index
    %c0_87 = arith.constant 0 : index
    %c0_88 = arith.constant 0 : index
    %132 = vector.load %arg2[%131, %c0_87, %c0_88] : memref<8x16x128xbf16, #tpu.memory_space<vmem>>, vector<1x16x128xbf16>
    %133 = vector.shape_cast %132 : vector<1x16x128xbf16> to vector<16x128xbf16>
    %c0_89 = arith.constant 0 : index
    %c0_90 = arith.constant 0 : index
    %134 = vector.load %arg10[%c0_89, %c0_90] : memref<16x256xbf16, #tpu.memory_space<vmem>>, vector<16x128xbf16>
    tpu.vector_store %arg10[%c0_89, %c0_90], %133 {strides = array<i32>} : memref<16x256xbf16, #tpu.memory_space<vmem>>, vector<16x128xbf16>,
    %c0_91 = arith.constant 0 : index
    %c0_92 = arith.constant 0 : index
    %135 = vector.load %arg10[%c0_91, %c0_92] : memref<16x256xbf16, #tpu.memory_space<vmem>>, vector<16x256xbf16>
    %c0_93 = arith.constant 0 : index
    %c0_94 = arith.constant 0 : index
    %136 = vector.load %arg4[%c0_93, %c0_94] : memref<256x128xbf16, #tpu.memory_space<vmem>>, vector<256x128xbf16>
    %cst_95 = arith.constant dense<0.000000e+00> : vector<16x128xf32>
    %137 = tpu.matmul %135, %136, %cst_95 {dimension_numbers = #tpu.dot_dimension_numbers<[1], [0], [0], [1], [0, 0, 1, 1], [], []>} : vector<16x256xbf16>, vector<256x128xbf16>, vector<16x128xf32> -> vector<16x128xf32>
    %c0_96 = arith.constant 0 : index
    %c0_97 = arith.constant 0 : index
    %138 = vector.load %arg5[%c0_96, %c0_97] : memref<1x128xf32, #tpu.memory_space<vmem>>, vector<1x128xf32>
    %139 = vector.broadcast %138 : vector<1x128xf32> to vector<16x128xf32>
    %140 = arith.addf %137, %139 : vector<16x128xf32>
    %141 = math.tanh %140 : vector<16x128xf32>
    %142 = arith.truncf %141 : vector<16x128xf32> to vector<16x128xbf16>
    %c0_98 = arith.constant 0 : index
    %c128_99 = arith.constant 128 : index
    %143 = vector.load %arg10[%c0_98, %c128_99] : memref<16x256xbf16, #tpu.memory_space<vmem>>, vector<16x128xbf16>
    tpu.vector_store %arg10[%c0_98, %c128_99], %142 {strides = array<i32>} : memref<16x256xbf16, #tpu.memory_space<vmem>>, vector<16x128xbf16>,
    %c0_100 = arith.constant 0 : index
    %c0_101 = arith.constant 0 : index
    %144 = vector.load %arg6[%c0_100, %c0_101] : memref<128x128xbf16, #tpu.memory_space<vmem>>, vector<128x128xbf16>
    %cst_102 = arith.constant dense<0.000000e+00> : vector<16x128xf32>
    %145 = tpu.matmul %142, %144, %cst_102 {dimension_numbers = #tpu.dot_dimension_numbers<[1], [0], [0], [1], [0, 0, 1, 1], [], []>} : vector<16x128xbf16>, vector<128x128xbf16>, vector<16x128xf32> -> vector<16x128xf32>
    %c0_103 = arith.constant 0 : index
    %c0_104 = arith.constant 0 : index
    %146 = vector.load %arg7[%c0_103, %c0_104] : memref<1x128xf32, #tpu.memory_space<vmem>>, vector<1x128xf32>
    %147 = vector.broadcast %146 : vector<1x128xf32> to vector<16x128xf32>
    %148 = arith.addf %145, %147 : vector<16x128xf32>
    %cst_105 = arith.constant dense<0xFF800000> : vector<16xf32>
    %149 = vector.multi_reduction <maximumf>, %148, %cst_105 [1] : vector<16x128xf32> to vector<16xf32>
    %150 = vector.shape_cast %149 : vector<16xf32> to vector<16x1xf32>
    %151 = vector.broadcast %150 : vector<16x1xf32> to vector<16x128xf32>
    %152 = arith.subf %148, %151 : vector<16x128xf32>
    %153 = math.exp %152 : vector<16x128xf32>
    %cst_106 = arith.constant dense<0.000000e+00> : vector<16xf32>
    %154 = vector.multi_reduction <add>, %153, %cst_106 [1] : vector<16x128xf32> to vector<16xf32>
    %155 = vector.shape_cast %154 : vector<16xf32> to vector<16x1xf32>
    %156 = math.log %155 : vector<16x1xf32>
    %157 = vector.broadcast %156 : vector<16x1xf32> to vector<16x128xf32>
    %158 = arith.subf %152, %157 : vector<16x128xf32>
    %159 = arith.index_cast %c4_i32 : i32 to index
    %c0_107 = arith.constant 0 : index
    %c0_108 = arith.constant 0 : index
    %160 = vector.load %arg8[%159, %c0_107, %c0_108] : memref<8x16x128xf32, #tpu.memory_space<vmem>>, vector<1x16x128xf32>
    %161 = vector.shape_cast %160 : vector<1x16x128xf32> to vector<16x128xf32>
    %162 = vector.shape_cast %158 : vector<16x128xf32> to vector<1x16x128xf32>
    tpu.vector_store %arg8[%159, %c0_107, %c0_108], %162 {strides = array<i32>} : memref<8x16x128xf32, #tpu.memory_space<vmem>>, vector<1x16x128xf32>,
    %c5_i32 = arith.constant 5 : i32
    %163 = arith.index_cast %c5_i32 : i32 to index
    %c0_109 = arith.constant 0 : index
    %c0_110 = arith.constant 0 : index
    %164 = vector.load %arg2[%163, %c0_109, %c0_110] : memref<8x16x128xbf16, #tpu.memory_space<vmem>>, vector<1x16x128xbf16>
    %165 = vector.shape_cast %164 : vector<1x16x128xbf16> to vector<16x128xbf16>
    %c0_111 = arith.constant 0 : index
    %c0_112 = arith.constant 0 : index
    %166 = vector.load %arg10[%c0_111, %c0_112] : memref<16x256xbf16, #tpu.memory_space<vmem>>, vector<16x128xbf16>
    tpu.vector_store %arg10[%c0_111, %c0_112], %165 {strides = array<i32>} : memref<16x256xbf16, #tpu.memory_space<vmem>>, vector<16x128xbf16>,
    %c0_113 = arith.constant 0 : index
    %c0_114 = arith.constant 0 : index
    %167 = vector.load %arg10[%c0_113, %c0_114] : memref<16x256xbf16, #tpu.memory_space<vmem>>, vector<16x256xbf16>
    %c0_115 = arith.constant 0 : index
    %c0_116 = arith.constant 0 : index
    %168 = vector.load %arg4[%c0_115, %c0_116] : memref<256x128xbf16, #tpu.memory_space<vmem>>, vector<256x128xbf16>
    %cst_117 = arith.constant dense<0.000000e+00> : vector<16x128xf32>
    %169 = tpu.matmul %167, %168, %cst_117 {dimension_numbers = #tpu.dot_dimension_numbers<[1], [0], [0], [1], [0, 0, 1, 1], [], []>} : vector<16x256xbf16>, vector<256x128xbf16>, vector<16x128xf32> -> vector<16x128xf32>
    %c0_118 = arith.constant 0 : index
    %c0_119 = arith.constant 0 : index
    %170 = vector.load %arg5[%c0_118, %c0_119] : memref<1x128xf32, #tpu.memory_space<vmem>>, vector<1x128xf32>
    %171 = vector.broadcast %170 : vector<1x128xf32> to vector<16x128xf32>
    %172 = arith.addf %169, %171 : vector<16x128xf32>
    %173 = math.tanh %172 : vector<16x128xf32>
    %174 = arith.truncf %173 : vector<16x128xf32> to vector<16x128xbf16>
    %c0_120 = arith.constant 0 : index
    %c128_121 = arith.constant 128 : index
    %175 = vector.load %arg10[%c0_120, %c128_121] : memref<16x256xbf16, #tpu.memory_space<vmem>>, vector<16x128xbf16>
    tpu.vector_store %arg10[%c0_120, %c128_121], %174 {strides = array<i32>} : memref<16x256xbf16, #tpu.memory_space<vmem>>, vector<16x128xbf16>,
    %c0_122 = arith.constant 0 : index
    %c0_123 = arith.constant 0 : index
    %176 = vector.load %arg6[%c0_122, %c0_123] : memref<128x128xbf16, #tpu.memory_space<vmem>>, vector<128x128xbf16>
    %cst_124 = arith.constant dense<0.000000e+00> : vector<16x128xf32>
    %177 = tpu.matmul %174, %176, %cst_124 {dimension_numbers = #tpu.dot_dimension_numbers<[1], [0], [0], [1], [0, 0, 1, 1], [], []>} : vector<16x128xbf16>, vector<128x128xbf16>, vector<16x128xf32> -> vector<16x128xf32>
    %c0_125 = arith.constant 0 : index
    %c0_126 = arith.constant 0 : index
    %178 = vector.load %arg7[%c0_125, %c0_126] : memref<1x128xf32, #tpu.memory_space<vmem>>, vector<1x128xf32>
    %179 = vector.broadcast %178 : vector<1x128xf32> to vector<16x128xf32>
    %180 = arith.addf %177, %179 : vector<16x128xf32>
    %cst_127 = arith.constant dense<0xFF800000> : vector<16xf32>
    %181 = vector.multi_reduction <maximumf>, %180, %cst_127 [1] : vector<16x128xf32> to vector<16xf32>
    %182 = vector.shape_cast %181 : vector<16xf32> to vector<16x1xf32>
    %183 = vector.broadcast %182 : vector<16x1xf32> to vector<16x128xf32>
    %184 = arith.subf %180, %183 : vector<16x128xf32>
    %185 = math.exp %184 : vector<16x128xf32>
    %cst_128 = arith.constant dense<0.000000e+00> : vector<16xf32>
    %186 = vector.multi_reduction <add>, %185, %cst_128 [1] : vector<16x128xf32> to vector<16xf32>
    %187 = vector.shape_cast %186 : vector<16xf32> to vector<16x1xf32>
    %188 = math.log %187 : vector<16x1xf32>
    %189 = vector.broadcast %188 : vector<16x1xf32> to vector<16x128xf32>
    %190 = arith.subf %184, %189 : vector<16x128xf32>
    %191 = arith.index_cast %c5_i32 : i32 to index
    %c0_129 = arith.constant 0 : index
    %c0_130 = arith.constant 0 : index
    %192 = vector.load %arg8[%191, %c0_129, %c0_130] : memref<8x16x128xf32, #tpu.memory_space<vmem>>, vector<1x16x128xf32>
    %193 = vector.shape_cast %192 : vector<1x16x128xf32> to vector<16x128xf32>
    %194 = vector.shape_cast %190 : vector<16x128xf32> to vector<1x16x128xf32>
    tpu.vector_store %arg8[%191, %c0_129, %c0_130], %194 {strides = array<i32>} : memref<8x16x128xf32, #tpu.memory_space<vmem>>, vector<1x16x128xf32>,
    %c6_i32 = arith.constant 6 : i32
    %195 = arith.index_cast %c6_i32 : i32 to index
    %c0_131 = arith.constant 0 : index
    %c0_132 = arith.constant 0 : index
    %196 = vector.load %arg2[%195, %c0_131, %c0_132] : memref<8x16x128xbf16, #tpu.memory_space<vmem>>, vector<1x16x128xbf16>
    %197 = vector.shape_cast %196 : vector<1x16x128xbf16> to vector<16x128xbf16>
    %c0_133 = arith.constant 0 : index
    %c0_134 = arith.constant 0 : index
    %198 = vector.load %arg10[%c0_133, %c0_134] : memref<16x256xbf16, #tpu.memory_space<vmem>>, vector<16x128xbf16>
    tpu.vector_store %arg10[%c0_133, %c0_134], %197 {strides = array<i32>} : memref<16x256xbf16, #tpu.memory_space<vmem>>, vector<16x128xbf16>,
    %c0_135 = arith.constant 0 : index
    %c0_136 = arith.constant 0 : index
    %199 = vector.load %arg10[%c0_135, %c0_136] : memref<16x256xbf16, #tpu.memory_space<vmem>>, vector<16x256xbf16>
    %c0_137 = arith.constant 0 : index
    %c0_138 = arith.constant 0 : index
    %200 = vector.load %arg4[%c0_137, %c0_138] : memref<256x128xbf16, #tpu.memory_space<vmem>>, vector<256x128xbf16>
    %cst_139 = arith.constant dense<0.000000e+00> : vector<16x128xf32>
    %201 = tpu.matmul %199, %200, %cst_139 {dimension_numbers = #tpu.dot_dimension_numbers<[1], [0], [0], [1], [0, 0, 1, 1], [], []>} : vector<16x256xbf16>, vector<256x128xbf16>, vector<16x128xf32> -> vector<16x128xf32>
    %c0_140 = arith.constant 0 : index
    %c0_141 = arith.constant 0 : index
    %202 = vector.load %arg5[%c0_140, %c0_141] : memref<1x128xf32, #tpu.memory_space<vmem>>, vector<1x128xf32>
    %203 = vector.broadcast %202 : vector<1x128xf32> to vector<16x128xf32>
    %204 = arith.addf %201, %203 : vector<16x128xf32>
    %205 = math.tanh %204 : vector<16x128xf32>
    %206 = arith.truncf %205 : vector<16x128xf32> to vector<16x128xbf16>
    %c0_142 = arith.constant 0 : index
    %c128_143 = arith.constant 128 : index
    %207 = vector.load %arg10[%c0_142, %c128_143] : memref<16x256xbf16, #tpu.memory_space<vmem>>, vector<16x128xbf16>
    tpu.vector_store %arg10[%c0_142, %c128_143], %206 {strides = array<i32>} : memref<16x256xbf16, #tpu.memory_space<vmem>>, vector<16x128xbf16>,
    %c0_144 = arith.constant 0 : index
    %c0_145 = arith.constant 0 : index
    %208 = vector.load %arg6[%c0_144, %c0_145] : memref<128x128xbf16, #tpu.memory_space<vmem>>, vector<128x128xbf16>
    %cst_146 = arith.constant dense<0.000000e+00> : vector<16x128xf32>
    %209 = tpu.matmul %206, %208, %cst_146 {dimension_numbers = #tpu.dot_dimension_numbers<[1], [0], [0], [1], [0, 0, 1, 1], [], []>} : vector<16x128xbf16>, vector<128x128xbf16>, vector<16x128xf32> -> vector<16x128xf32>
    %c0_147 = arith.constant 0 : index
    %c0_148 = arith.constant 0 : index
    %210 = vector.load %arg7[%c0_147, %c0_148] : memref<1x128xf32, #tpu.memory_space<vmem>>, vector<1x128xf32>
    %211 = vector.broadcast %210 : vector<1x128xf32> to vector<16x128xf32>
    %212 = arith.addf %209, %211 : vector<16x128xf32>
    %cst_149 = arith.constant dense<0xFF800000> : vector<16xf32>
    %213 = vector.multi_reduction <maximumf>, %212, %cst_149 [1] : vector<16x128xf32> to vector<16xf32>
    %214 = vector.shape_cast %213 : vector<16xf32> to vector<16x1xf32>
    %215 = vector.broadcast %214 : vector<16x1xf32> to vector<16x128xf32>
    %216 = arith.subf %212, %215 : vector<16x128xf32>
    %217 = math.exp %216 : vector<16x128xf32>
    %cst_150 = arith.constant dense<0.000000e+00> : vector<16xf32>
    %218 = vector.multi_reduction <add>, %217, %cst_150 [1] : vector<16x128xf32> to vector<16xf32>
    %219 = vector.shape_cast %218 : vector<16xf32> to vector<16x1xf32>
    %220 = math.log %219 : vector<16x1xf32>
    %221 = vector.broadcast %220 : vector<16x1xf32> to vector<16x128xf32>
    %222 = arith.subf %216, %221 : vector<16x128xf32>
    %223 = arith.index_cast %c6_i32 : i32 to index
    %c0_151 = arith.constant 0 : index
    %c0_152 = arith.constant 0 : index
    %224 = vector.load %arg8[%223, %c0_151, %c0_152] : memref<8x16x128xf32, #tpu.memory_space<vmem>>, vector<1x16x128xf32>
    %225 = vector.shape_cast %224 : vector<1x16x128xf32> to vector<16x128xf32>
    %226 = vector.shape_cast %222 : vector<16x128xf32> to vector<1x16x128xf32>
    tpu.vector_store %arg8[%223, %c0_151, %c0_152], %226 {strides = array<i32>} : memref<8x16x128xf32, #tpu.memory_space<vmem>>, vector<1x16x128xf32>,
    %c7_i32 = arith.constant 7 : i32
    %227 = arith.index_cast %c7_i32 : i32 to index
    %c0_153 = arith.constant 0 : index
    %c0_154 = arith.constant 0 : index
    %228 = vector.load %arg2[%227, %c0_153, %c0_154] : memref<8x16x128xbf16, #tpu.memory_space<vmem>>, vector<1x16x128xbf16>
    %229 = vector.shape_cast %228 : vector<1x16x128xbf16> to vector<16x128xbf16>
    %c0_155 = arith.constant 0 : index
    %c0_156 = arith.constant 0 : index
    %230 = vector.load %arg10[%c0_155, %c0_156] : memref<16x256xbf16, #tpu.memory_space<vmem>>, vector<16x128xbf16>
    tpu.vector_store %arg10[%c0_155, %c0_156], %229 {strides = array<i32>} : memref<16x256xbf16, #tpu.memory_space<vmem>>, vector<16x128xbf16>,
    %c0_157 = arith.constant 0 : index
    %c0_158 = arith.constant 0 : index
    %231 = vector.load %arg10[%c0_157, %c0_158] : memref<16x256xbf16, #tpu.memory_space<vmem>>, vector<16x256xbf16>
    %c0_159 = arith.constant 0 : index
    %c0_160 = arith.constant 0 : index
    %232 = vector.load %arg4[%c0_159, %c0_160] : memref<256x128xbf16, #tpu.memory_space<vmem>>, vector<256x128xbf16>
    %cst_161 = arith.constant dense<0.000000e+00> : vector<16x128xf32>
    %233 = tpu.matmul %231, %232, %cst_161 {dimension_numbers = #tpu.dot_dimension_numbers<[1], [0], [0], [1], [0, 0, 1, 1], [], []>} : vector<16x256xbf16>, vector<256x128xbf16>, vector<16x128xf32> -> vector<16x128xf32>
    %c0_162 = arith.constant 0 : index
    %c0_163 = arith.constant 0 : index
    %234 = vector.load %arg5[%c0_162, %c0_163] : memref<1x128xf32, #tpu.memory_space<vmem>>, vector<1x128xf32>
    %235 = vector.broadcast %234 : vector<1x128xf32> to vector<16x128xf32>
    %236 = arith.addf %233, %235 : vector<16x128xf32>
    %237 = math.tanh %236 : vector<16x128xf32>
    %238 = arith.truncf %237 : vector<16x128xf32> to vector<16x128xbf16>
    %c0_164 = arith.constant 0 : index
    %c128_165 = arith.constant 128 : index
    %239 = vector.load %arg10[%c0_164, %c128_165] : memref<16x256xbf16, #tpu.memory_space<vmem>>, vector<16x128xbf16>
    tpu.vector_store %arg10[%c0_164, %c128_165], %238 {strides = array<i32>} : memref<16x256xbf16, #tpu.memory_space<vmem>>, vector<16x128xbf16>,
    %c0_166 = arith.constant 0 : index
    %c0_167 = arith.constant 0 : index
    %240 = vector.load %arg6[%c0_166, %c0_167] : memref<128x128xbf16, #tpu.memory_space<vmem>>, vector<128x128xbf16>
    %cst_168 = arith.constant dense<0.000000e+00> : vector<16x128xf32>
    %241 = tpu.matmul %238, %240, %cst_168 {dimension_numbers = #tpu.dot_dimension_numbers<[1], [0], [0], [1], [0, 0, 1, 1], [], []>} : vector<16x128xbf16>, vector<128x128xbf16>, vector<16x128xf32> -> vector<16x128xf32>
    %c0_169 = arith.constant 0 : index
    %c0_170 = arith.constant 0 : index
    %242 = vector.load %arg7[%c0_169, %c0_170] : memref<1x128xf32, #tpu.memory_space<vmem>>, vector<1x128xf32>
    %243 = vector.broadcast %242 : vector<1x128xf32> to vector<16x128xf32>
    %244 = arith.addf %241, %243 : vector<16x128xf32>
    %cst_171 = arith.constant dense<0xFF800000> : vector<16xf32>
    %245 = vector.multi_reduction <maximumf>, %244, %cst_171 [1] : vector<16x128xf32> to vector<16xf32>
    %246 = vector.shape_cast %245 : vector<16xf32> to vector<16x1xf32>
    %247 = vector.broadcast %246 : vector<16x1xf32> to vector<16x128xf32>
    %248 = arith.subf %244, %247 : vector<16x128xf32>
    %249 = math.exp %248 : vector<16x128xf32>
    %cst_172 = arith.constant dense<0.000000e+00> : vector<16xf32>
    %250 = vector.multi_reduction <add>, %249, %cst_172 [1] : vector<16x128xf32> to vector<16xf32>
    %251 = vector.shape_cast %250 : vector<16xf32> to vector<16x1xf32>
    %252 = math.log %251 : vector<16x1xf32>
    %253 = vector.broadcast %252 : vector<16x1xf32> to vector<16x128xf32>
    %254 = arith.subf %248, %253 : vector<16x128xf32>
    %255 = arith.index_cast %c7_i32 : i32 to index
    %c0_173 = arith.constant 0 : index
    %c0_174 = arith.constant 0 : index
    %256 = vector.load %arg8[%255, %c0_173, %c0_174] : memref<8x16x128xf32, #tpu.memory_space<vmem>>, vector<1x16x128xf32>
    %257 = vector.shape_cast %256 : vector<1x16x128xf32> to vector<16x128xf32>
    %258 = vector.shape_cast %254 : vector<16x128xf32> to vector<1x16x128xf32>
    tpu.vector_store %arg8[%255, %c0_173, %c0_174], %258 {strides = array<i32>} : memref<8x16x128xf32, #tpu.memory_space<vmem>>, vector<1x16x128xf32>,
    %c8_i32 = arith.constant 8 : i32
    %c0_i32_175 = arith.constant 0 : i32
    %259 = arith.cmpi eq, %arg1, %c0_i32_175 : i32
    %260 = arith.extui %259 : i1 to i32
    %c0_i32_176 = arith.constant 0 : i32
    %261 = arith.cmpi ne, %260, %c0_i32_176 : i32
    scf.if %261 {
      %c0_177 = arith.constant 0 : index
      %c128_178 = arith.constant 128 : index
      %262 = vector.load %arg10[%c0_177, %c128_178] : memref<16x256xbf16, #tpu.memory_space<vmem>>, vector<16x128xbf16>
      %263 = arith.extf %262 : vector<16x128xbf16> to vector<16x128xf32>
      %c0_179 = arith.constant 0 : index
      %c0_180 = arith.constant 0 : index
      %264 = vector.load %arg9[%c0_179, %c0_180] : memref<16x128xf32, #tpu.memory_space<vmem>>, vector<16x128xf32>
      tpu.vector_store %arg9[%c0_179, %c0_180], %263 {strides = array<i32>} : memref<16x128xf32, #tpu.memory_space<vmem>>, vector<16x128xf32>,
    } else {
    }
    return
  }
  func.func @transform_0(%arg0: i32, %arg1: i32) -> (i32, i32, i32) {
    %c0_i32 = arith.constant 0 : i32
    %c0_i32_0 = arith.constant 0 : i32
    return %arg1, %arg0, %c0_i32 : i32, i32, i32
  }
  func.func @transform_1(%arg0: i32, %arg1: i32) -> (i32, i32) {
    %c0_i32 = arith.constant 0 : i32
    %c0_i32_0 = arith.constant 0 : i32
    return %arg0, %c0_i32 : i32, i32
  }
  func.func @transform_2(%arg0: i32, %arg1: i32) -> (i32, i32) {
    %c0_i32 = arith.constant 0 : i32
    %c0_i32_0 = arith.constant 0 : i32
    %c0_i32_1 = arith.constant 0 : i32
    return %c0_i32, %c0_i32_0 : i32, i32
  }
  func.func @transform_3(%arg0: i32, %arg1: i32) -> (i32, i32) {
    %c0_i32 = arith.constant 0 : i32
    %c0_i32_0 = arith.constant 0 : i32
    %c0_i32_1 = arith.constant 0 : i32
    return %c0_i32, %c0_i32_0 : i32, i32
  }
  func.func @transform_4(%arg0: i32, %arg1: i32) -> (i32, i32) {
    %c0_i32 = arith.constant 0 : i32
    %c0_i32_0 = arith.constant 0 : i32
    %c0_i32_1 = arith.constant 0 : i32
    return %c0_i32, %c0_i32_0 : i32, i32
  }
  func.func @transform_5(%arg0: i32, %arg1: i32) -> (i32, i32) {
    %c0_i32 = arith.constant 0 : i32
    %c0_i32_0 = arith.constant 0 : i32
    %c0_i32_1 = arith.constant 0 : i32
    return %c0_i32, %c0_i32_0 : i32, i32
  }
  func.func @transform_6(%arg0: i32, %arg1: i32) -> (i32, i32, i32) {
    %c0_i32 = arith.constant 0 : i32
    %c0_i32_0 = arith.constant 0 : i32
    return %arg1, %arg0, %c0_i32 : i32, i32, i32
  }
  func.func @transform_7(%arg0: i32, %arg1: i32) -> (i32, i32) {
    %c0_i32 = arith.constant 0 : i32
    %c0_i32_0 = arith.constant 0 : i32
    return %arg0, %c0_i32 : i32, i32
  }
}

</mosaic_0001>

<bundles_post_ra>
// kernel: tpu_custom_call.1
= control target key start
LH: loop header
LB: loop body
LE: loop exit
PB: predicated region body
PF: predicated region fallthrough
CT: control target
= control target key end

     0   :  { %13 = vsyncpa [#allocation4], 0  ;;  %s4231_s0 = inlined_call_operand.hbm [shape: bf16[8,16,128], index: 0, kind: input, shape index: {}]   ;;  %s4232_s1 = inlined_call_operand.hbm [shape: f32[16,128], index: 1, kind: input, shape index: {}]   ;;  %s4233_s2 = inlined_call_operand.hbm [shape: bf16[256,128], index: 2, kind: input, shape index: {}]   ;;  %s4234_s3 = inlined_call_operand.vmem [shape: f32[1,128], index: 3, kind: input, shape index: {}]   ;;  %s4235_s4 = inlined_call_operand.hbm [shape: bf16[128,128], index: 4, kind: input, shape index: {}]   ;;  %s4236_s5 = inlined_call_operand.vmem [shape: f32[1,128], index: 5, kind: input, shape index: {}]   ;;  %s4237_s6 = inlined_call_operand.hbm [shape: f32[8,16,128], index: 6, kind: output, shape index: {0}]   ;;  %s4238_s7 = inlined_call_operand.hbm [shape: f32[16,128], index: 7, kind: output, shape index: {1}]  }
   0x1   :  { %14 = vsyncpa [#allocation7], 0 }
   0x2   :  { %15 = vsyncpa [#allocation10], 0 }
   0x3   :  { %16 = vsyncpa [#allocation5], 0 }
   0x4   :  { %17 = vsyncpa [#allocation13], 0  ;;  %s3822_s24 = smov [#allocation6]   ;;  %s3680_s28 = scalar_lea.hbm %s4232_s1, 256 }
   0x5   :  { %s35_s25 = sshll.u32 %s3822_s24, 4  ;;  %p3681_p0 = scmp.ne.s32.totalorder %s4232_s1, %s3680_s28  ;;  %s36_s25 = int_to_ptr.vmem [resolvable:$true] %s35_s25 }
   0x6   :  { %p3684_p1 = scmp.lt.u32.totalorder %s3680_s28, %s4232_s1 }
   0x8   :  { %p3686_p2 = pnand %p3684_p1, %p3681_p0 }
   0xa   :  { %3689 = shalt.err (!%p3686_p2)
}
   0xb   :  { %s3690_s10 = scalar_lea.vmem %s36_s25, 256  ;;  %p3695_p4 = scmp.lt.s32.totalorder %s36_s25, %s36_s25 }
   0xc   :  { %p3691_p3 = scmp.ne.s32.totalorder %s36_s25, %s3690_s10  ;;  %p3696_p5 = scmp.lt.s32.totalorder %s3690_s10, %s3690_s10 }
   0xe   :  { %p3697_p6 = por %p3696_p5, %p3695_p4 }
  0x10   :  { %p3698_p7 = pnand %p3697_p6, %p3691_p3 }
  0x12   :  { %3701 = shalt.err (!%p3698_p7)
}
  0x13   :  { %s3823_s11 = smov 128   ;;  %s3824_s12 = smov 8  }
  0x14   :  { %41 = dma.hbm_to_vmem [thread:$0]  %s4232_s1, 256, %s36_s25, [#allocation7], %s3823_s11, %s3823_s11, %s3824_s12  }
  0x15   :  { %s3825_s15 = smov [#allocation3]   ;;  %s3702_s19 = scalar_lea.hbm %s4231_s0, 1024 }
  0x16   :  { %s23_s16 = sshll.u32 %s3825_s15, 4  ;;  %p3703_p8 = scmp.ne.s32.totalorder %s4231_s0, %s3702_s19  ;;  %s24_s16 = int_to_ptr.vmem [resolvable:$true] %s23_s16 }
  0x17   :  { %p3706_p9 = scmp.lt.u32.totalorder %s3702_s19, %s4231_s0 }
  0x19   :  { %p3708_p10 = pnand %p3706_p9, %p3703_p8 }
  0x1b   :  { %3711 = shalt.err (!%p3708_p10)
}
  0x1c   :  { %s3712_s24 = scalar_lea.vmem %s24_s16, 1024  ;;  %p3717_p12 = scmp.lt.s32.totalorder %s24_s16, %s24_s16 }
  0x1d   :  { %p3713_p11 = scmp.ne.s32.totalorder %s24_s16, %s3712_s24  ;;  %p3718_p13 = scmp.lt.s32.totalorder %s3712_s24, %s3712_s24 }
  0x1f   :  { %p3719_p0 = por %p3718_p13, %p3717_p12 }
  0x21   :  { %p3720_p1 = pnand %p3719_p0, %p3713_p11 }
  0x23   :  { %3723 = shalt.err (!%p3720_p1)
}
  0x24   :  { %s3826_s1 = smov 64   ;;  %s3827_s25 = smov 4  }
  0x25   :  { %29 = dma.hbm_to_vmem [thread:$0]  %s4231_s0, 1024, %s24_s16, [#allocation4], %s3826_s1, %s3826_s1, %s3827_s25  }
  0x26   :  { %s3828_s28 = smov [#allocation8]   ;;  %s3829_s30 = smov [#allocation9]  }
  0x27   :  { %s47_s29 = sshll.u32 %s3828_s28, 4  ;;  %s61_s8 = sshll.u32 %s3829_s30, 4  ;;  %s48_s29 = int_to_ptr.vmem [resolvable:$true] %s47_s29  ;;  %s3904_s8 = int_to_ptr.vmem [resolvable:$true] %s61_s8 }
  0x28   :  { %s3724_s13 = scalar_lea.hbm %s4233_s2, 2048 }
  0x29   :  { %p3725_p2 = scmp.ne.s32.totalorder %s4233_s2, %s3724_s13  ;;  %p3728_p3 = scmp.lt.u32.totalorder %s3724_s13, %s4233_s2 }
  0x2b   :  { %p3730_p4 = pnand %p3728_p3, %p3725_p2 }
  0x2d   :  { %3733 = shalt.err (!%p3730_p4)
}
  0x2e   :  { %s3734_s0 = scalar_lea.vmem %s48_s29, 2048  ;;  %p3739_p6 = scmp.lt.s32.totalorder %s48_s29, %s48_s29 }
  0x2f   :  { %p3735_p5 = scmp.ne.s32.totalorder %s48_s29, %s3734_s0  ;;  %p3740_p7 = scmp.lt.s32.totalorder %s3734_s0, %s3734_s0 }
  0x31   :  { %p3741_p8 = por %p3740_p7, %p3739_p6 }
  0x33   :  { %p3742_p9 = pnand %p3741_p8, %p3735_p5 }
  0x35   :  { %3745 = shalt.err (!%p3742_p9)
}
  0x36   :  { %53 = dma.hbm_to_vmem [thread:$0]  %s4233_s2, 2048, %s48_s29, [#allocation7], %s3826_s1, %s3826_s1, %s3827_s25  }
  0x37   :  { %s3746_s22 = scalar_lea.hbm %s4235_s4, 1024 }
  0x38   :  { %p3747_p10 = scmp.ne.s32.totalorder %s4235_s4, %s3746_s22  ;;  %p3750_p11 = scmp.lt.u32.totalorder %s3746_s22, %s4235_s4 }
  0x3a   :  { %p3752_p12 = pnand %p3750_p11, %p3747_p10 }
  0x3c   :  { %3755 = shalt.err (!%p3752_p12)
}
  0x3d   :  { %s3756_s28 = scalar_lea.vmem %s3904_s8, 1024  ;;  %p3761_p0 = scmp.lt.s32.totalorder %s3904_s8, %s3904_s8 }
  0x3e   :  { %p3757_p13 = scmp.ne.s32.totalorder %s3904_s8, %s3756_s28  ;;  %p3762_p1 = scmp.lt.s32.totalorder %s3756_s28, %s3756_s28 }
  0x40   :  { %p3763_p2 = por %p3762_p1, %p3761_p0 }
  0x42   :  { %p3764_p3 = pnand %p3763_p2, %p3757_p13 }
  0x44   :  { %3767 = shalt.err (!%p3764_p3)
}
  0x45   :  { %67 = dma.hbm_to_vmem [thread:$0]  %s4235_s4, 1024, %s3904_s8, [#allocation10], %s3826_s1, %s3826_s1, %s3827_s25  }
  0x46   :  { %3812 = dma.done.wait [#allocation4], 1024  }
  0x47   :  { %3813 = vsyncadd [#allocation4], 4294966272 }
  0x48   :  { %3814 = dma.done.wait [#allocation7], 2304  }
  0x49   :  { %3815 = vsyncadd [#allocation7], 4294964992 }
  0x4a   :  { %3816 = dma.done.wait [#allocation10], 1024  }
  0x4b   :  { %3817 = vsyncadd [#allocation10], 4294966272  ;;  %v3830_v0 = vmov 0.0   ;;  %v3384_v1 = vld [vmem:[#allocation8 + $0x40] sm:$0xff]   ;;  %v3386_v3 = vld [vmem:[#allocation8 + $0x48] sm:$0xff]   ;;  %vm3831_vm0 = vmmov 0  }
  0x4c   :  { %3212 = vmatprep.subr.bf16.mxu1 %v3830_v0  ;;  %v3385_v2 = vld [vmem:[#allocation8] sm:$0xff]   ;;  %2964 = vmatprep.subr.bf16.mxu0 %v3384_v1  ;;  %v3387_v4 = vld [vmem:[#allocation8 + $0x8] sm:$0xff]   ;;  %v3388_v5 = vld [vmem:[#allocation8 + $0x50] sm:$0xff]  }
  0x4d   :  { %2965 = vmatpush3.bf16.msra.mxu0 %v3385_v2  ;;  %v3389_v6 = vld [vmem:[#allocation8 + $0x10] sm:$0xff]   ;;  %v3390_v7 = vld [vmem:[#allocation8 + $0x58] sm:$0xff]   ;;  %v3392_v9 = vld [vmem:[#allocation8 + $0x60] sm:$0xff]   ;;  %3228 = vmatprep.mubr.msk.bf16.mxu1 %vm3831_vm0, %v3830_v0 }
  0x4e   :  { %2966 = vmatprep.subr.bf16.mxu0 %v3386_v3  ;;  %v3391_v8 = vld [vmem:[#allocation8 + $0x18] sm:$0xff]   ;;  %v3393_v10 = vld [vmem:[#allocation8 + $0x20] sm:$0xff]   ;;  %v3394_v11 = vld [vmem:[#allocation8 + $0x68] sm:$0xff]  }
  0x4f   :  { %v87_v12 = vld [vmem:[#allocation6] sm:$0xff]  ;;  %v88_v13 = vld [vmem:[#allocation6 + $0x8] sm:$0xff]  ;;  %v3401_v15 = vld [vmem:[#allocation9] sm:$0xff]  }
  0x50   :  { %v89_v14 = vpack.c.bf16 %v88_v13, %v87_v12  ;;  %v3395_v16 = vld [vmem:[#allocation8 + $0x28] sm:$0xff]   ;;  %v3396_v17 = vld [vmem:[#allocation8 + $0x70] sm:$0xff]   ;;  %3213 = vmatpush3.bf16.msra.mxu1 %v3401_v15  ;;  %v3398_v20 = vld [vmem:[#allocation8 + $0x78] sm:$0xff]  }
  0x51   :  { %2967 = vmatpush3.bf16.msra.mxu0 %v3387_v4  ;;  %3214 = vmatprep.subr.bf16.mxu1 %v3830_v0  ;;  %v3404_v18 = vld [vmem:[#allocation9 + $0x8] sm:$0xff]   ;;  %v3397_v19 = vld [vmem:[#allocation8 + $0x30] sm:$0xff]   ;;  %v3399_v22 = vld [vmem:[#allocation8 + $0x38] sm:$0xff]  }
  0x52   :  { %2968 = vmatprep.subr.bf16.mxu0 %v3388_v5  ;;  %269 = vmatprep.mubr.bf16.mxu0 %v89_v14  ;;  %v3407_v21 = vld [vmem:[#allocation9 + $0x10] sm:$0xff]   ;;  %v3402_v23 = vld [vmem:[#allocation8 + $0x40] sm:$0xff]   ;;  %v3405_v26 = vld [vmem:[#allocation8 + $0x48] sm:$0xff]  }
  0x53   :  { %v3400_v24 = vld [vmem:[#allocation3] sm:$0xff]   ;;  %v3403_v25 = vld [vmem:[#allocation8] sm:$0xff]   ;;  %v3406_v27 = vld [vmem:[#allocation8 + $0x8] sm:$0xff]  }
  0x54   :  { %3215 = vmatpush3.bf16.msra.mxu1 %v3404_v18  ;;  %v3408_v28 = vld [vmem:[#allocation8 + $0x50] sm:$0xff]   ;;  %v3410_v30 = vld [vmem:[#allocation9 + $0x18] sm:$0xff]   ;;  %v3413_v33 = vld [vmem:[#allocation9 + $0x20] sm:$0xff]  }
  0x55   :  { %2969 = vmatpush3.bf16.msra.mxu0 %v3389_v6  ;;  %3216 = vmatprep.subr.bf16.mxu1 %v3830_v0  ;;  %v3409_v29 = vld [vmem:[#allocation8 + $0x10] sm:$0xff]   ;;  %v3411_v31 = vld [vmem:[#allocation8 + $0x58] sm:$0xff]   ;;  %v3414_v34 = vld [vmem:[#allocation8 + $0x60] sm:$0xff]  }
  0x56   :  { %2970 = vmatprep.subr.bf16.mxu0 %v3390_v7  ;;  %v3412_v32 = vld [vmem:[#allocation8 + $0x18] sm:$0xff]   ;;  %v3415_v35 = vld [vmem:[#allocation8 + $0x20] sm:$0xff]   ;;  %v3416_v36 = vld [vmem:[#allocation9 + $0x28] sm:$0xff]  }
  0x57   :  { %v3417_v37 = vld [vmem:[#allocation8 + $0x68] sm:$0xff]   ;;  %v3420_v39 = vld [vmem:[#allocation8 + $0x70] sm:$0xff]   ;;  %v3423_v42 = vld [vmem:[#allocation8 + $0x78] sm:$0xff]  }
  0x58   :  { %3217 = vmatpush3.bf16.msra.mxu1 %v3407_v21  ;;  %v3418_v38 = vld [vmem:[#allocation8 + $0x28] sm:$0xff]   ;;  %v3419_v40 = vld [vmem:[#allocation9 + $0x30] sm:$0xff]   ;;  %v3422_v43 = vld [vmem:[#allocation9 + $0x38] sm:$0xff]  }
  0x59   :  { %2971 = vmatpush3.bf16.msra.mxu0 %v3391_v8  ;;  %3218 = vmatprep.subr.bf16.mxu1 %v3830_v0  ;;  %v3421_v41 = vld [vmem:[#allocation8 + $0x30] sm:$0xff]   ;;  %v3424_v44 = vld [vmem:[#allocation8 + $0x38] sm:$0xff]   ;;  %v3427_v45 = vld [vmem:[#allocation8 + $0x40] sm:$0xff]  }
  0x5a   :  { %2972 = vmatprep.subr.bf16.mxu0 %v3392_v9  ;;  %v3955_v47 = vld [vmem:[%s4234_s3] ss:$0 sm:$0xff]  ;;  %v3425_v57 = vld [vmem:[#allocation3 + $0x8] sm:$0xff]   ;;  %v3426_v58 = vld [vmem:[#allocation9] sm:$0xff]  }
  0x5b   :  { %v3428_v60 = vld [vmem:[#allocation8] sm:$0xff]   ;;  %v3430_v61 = vld [vmem:[#allocation8 + $0x48] sm:$0xff]   ;;  %v3433_v1 = vld [vmem:[#allocation8 + $0x50] sm:$0xff]  }
  0x5c   :  { %3219 = vmatpush3.bf16.msra.mxu1 %v3410_v30  ;;  %v3429_v62 = vld [vmem:[#allocation9 + $0x8] sm:$0xff]   ;;  %v3432_v2 = vld [vmem:[#allocation9 + $0x10] sm:$0xff]   ;;  %v3435_v4 = vld [vmem:[#allocation9 + $0x18] sm:$0xff]  }
  0x5d   :  { %2973 = vmatpush3.bf16.msra.mxu0 %v3393_v10  ;;  %3220 = vmatprep.subr.bf16.mxu1 %v3830_v0  ;;  %v3431_v63 = vld [vmem:[#allocation8 + $0x8] sm:$0xff]   ;;  %v3434_v3 = vld [vmem:[#allocation8 + $0x10] sm:$0xff]   ;;  %v3436_v5 = vld [vmem:[#allocation8 + $0x58] sm:$0xff]  }
  0x5e   :  { %2974 = vmatprep.subr.bf16.mxu0 %v3394_v11  ;;  %v3437_v6 = vld [vmem:[#allocation8 + $0x18] sm:$0xff]   ;;  %v3438_v7 = vld [vmem:[#allocation9 + $0x20] sm:$0xff]   ;;  %v3441_v10 = vld [vmem:[#allocation9 + $0x28] sm:$0xff]  }
  0x5f   :  { %v3439_v8 = vld [vmem:[#allocation8 + $0x60] sm:$0xff]   ;;  %v3442_v11 = vld [vmem:[#allocation8 + $0x68] sm:$0xff]   ;;  %v3445_v13 = vld [vmem:[#allocation8 + $0x70] sm:$0xff]  }
  0x60   :  { %3221 = vmatpush3.bf16.msra.mxu1 %v3413_v33  ;;  %v3440_v9 = vld [vmem:[#allocation8 + $0x20] sm:$0xff]   ;;  %v3443_v12 = vld [vmem:[#allocation8 + $0x28] sm:$0xff]   ;;  %v3444_v14 = vld [vmem:[#allocation9 + $0x30] sm:$0xff]  }
  0x61   :  { %2975 = vmatpush3.bf16.msra.mxu0 %v3395_v16  ;;  %3222 = vmatprep.subr.bf16.mxu1 %v3830_v0  ;;  %v3446_v15 = vld [vmem:[#allocation8 + $0x30] sm:$0xff]   ;;  %v3448_v16 = vld [vmem:[#allocation8 + $0x78] sm:$0xff]  }
  0x62   :  { %2976 = vmatprep.subr.bf16.mxu0 %v3396_v17  ;;  %v3447_v17 = vld [vmem:[#allocation9 + $0x38] sm:$0xff]  }
  0x63   :  { %v3449_v18 = vld [vmem:[#allocation8 + $0x38] sm:$0xff]  }
  0x64   :  { %3223 = vmatpush3.bf16.msra.mxu1 %v3416_v36  ;;  %v3450_v36 = vld [vmem:[#allocation3 + $0x10] sm:$0xff]  }
  0x65   :  { %2977 = vmatpush3.bf16.msra.mxu0 %v3397_v19  ;;  %3224 = vmatprep.subr.bf16.mxu1 %v3830_v0  ;;  %v3972_v19 = vld [vmem:[%s4236_s5] ss:$0 sm:$0xff] }
  0x66   :  { %2978 = vmatprep.subr.bf16.mxu0 %v3398_v20 }
  0x68   :  { %3225 = vmatpush3.bf16.msra.mxu1 %v3419_v40  ;;  %v3453_v40 = vld [vmem:[#allocation8] sm:$0xff]  }
  0x69   :  { %2979 = vmatpush3.bf16.msra.mxu0 %v3399_v22  ;;  %3226 = vmatprep.subr.bf16.mxu1 %v3830_v0 }
  0x6a   :  { %2995 = vmatprep.subr.bf16.mxu0 %v3402_v23 }
  0x6c   :  { %270 = vmatmul.mubr.bf16.vlgmr.msra.gmra.mrb[0].mxu0 %v3400_v24  ;;  %3227 = vmatpush3.bf16.msra.mxu1 %v3422_v43  ;;  %v3456_v43 = vld [vmem:[#allocation8 + $0x8] sm:$0xff]  }
  0x6d   :  { %2996 = vmatpush3.bf16.msra.mxu0 %v3403_v25  ;;  %3232 = vmatprep.subr.bf16.mxu1 %v3830_v0 }
  0x6e   :  { %2997 = vmatprep.subr.bf16.mxu0 %v3405_v26 }
  0x71   :  { %2998 = vmatpush3.bf16.msra.mxu0 %v3406_v27 }
  0x72   :  { %2999 = vmatprep.subr.bf16.mxu0 %v3408_v28 }
  0x75   :  { %3000 = vmatpush3.bf16.msra.mxu0 %v3409_v29 }
  0x76   :  { %3001 = vmatprep.subr.bf16.mxu0 %v3411_v31 }
  0x79   :  { %3002 = vmatpush3.bf16.msra.mxu0 %v3412_v32 }
  0x7a   :  { %3003 = vmatprep.subr.bf16.mxu0 %v3414_v34 }
  0x7d   :  { %3004 = vmatpush3.bf16.msra.mxu0 %v3415_v35 }
  0x7e   :  { %3005 = vmatprep.subr.bf16.mxu0 %v3417_v37 }
  0x81   :  { %3006 = vmatpush3.bf16.msra.mxu0 %v3418_v38  ;;  %v3451_v38 = vld [vmem:[#allocation9] sm:$0xff]  }
  0x82   :  { %3007 = vmatprep.subr.bf16.mxu0 %v3420_v39  ;;  %v3452_v39 = vld [vmem:[#allocation8 + $0x40] sm:$0xff]  }
  0x85   :  { %3008 = vmatpush3.bf16.msra.mxu0 %v3421_v41  ;;  %v3455_v41 = vld [vmem:[#allocation8 + $0x48] sm:$0xff]  }
  0x86   :  { %3009 = vmatprep.subr.bf16.mxu0 %v3423_v42  ;;  %v3454_v42 = vld [vmem:[#allocation9 + $0x8] sm:$0xff]  }
  0x89   :  { %3010 = vmatpush3.bf16.msra.mxu0 %v3424_v44  ;;  %v3458_v44 = vld [vmem:[#allocation8 + $0x50] sm:$0xff]  }
  0x8a   :  { %3026 = vmatprep.subr.bf16.mxu0 %v3427_v45  ;;  %v3457_v45 = vld [vmem:[#allocation9 + $0x10] sm:$0xff]  }
 0x13f   :  { %v2980_v46 = vpop.f32.mrb[0].mxu0 }
 0x140   :  { %v2981_v48 = vpop.f32.mrb[1].mxu0 }
 0x141   :  { %v2982_v49 = vadd.f32 %v2981_v48, %v2980_v46  ;;  %v2983_v50 = vpop.f32.mrb[2].mxu0  ;;  %v3459_v46 = vld [vmem:[#allocation8 + $0x10] sm:$0xff]   ;;  %v3460_v48 = vld [vmem:[#allocation9 + $0x18] sm:$0xff]  }
 0x142   :  { %v2984_v51 = vpop.f32.mrb[3].mxu0 }
 0x143   :  { %v272_v52 = vadd.f32 %v2982_v49, %v3955_v47  ;;  %v2985_v53 = vadd.f32 %v2984_v51, %v2983_v50  ;;  %v3461_v49 = vld [vmem:[#allocation8 + $0x58] sm:$0xff]   ;;  %v3463_v51 = vld [vmem:[#allocation9 + $0x20] sm:$0xff]  }
 0x144   :  { %v3462_v50 = vld [vmem:[#allocation8 + $0x18] sm:$0xff]  }
 0x145   :  { %v275_v54 = vadd.f32 %v2985_v53, %v3955_v47  ;;  %3584 = vtanh.f32 %v272_v52  ;;  %v3464_v52 = vld [vmem:[#allocation8 + $0x60] sm:$0xff]  }
 0x146   :  { %v3465_v53 = vld [vmem:[#allocation8 + $0x20] sm:$0xff]  }
 0x147   :  { %3586 = vtanh.f32 %v275_v54  ;;  %v3466_v54 = vld [vmem:[#allocation9 + $0x28] sm:$0xff]  }
 0x14f   :  { %v3585_v55 = vpop.eup %3584 }
 0x151   :  { %v3587_v56 = vpop.eup %3586 }
 0x152   :  { %v280_v59 = vpack.c.bf16 %v3587_v56, %v3585_v55  ;;  %v3467_v55 = vld [vmem:[#allocation8 + $0x68] sm:$0xff]  }
 0x153   :  { %v3468_v56 = vld [vmem:[#allocation8 + $0x28] sm:$0xff]  }
 0x154   :  { %3229 = vmatmul.mubr.bf16.vlgmr.msra.gmra.mrb[0].mxu1 %v280_v59  ;;  %595 = vmatprep.mubr.bf16.mxu0 %v280_v59  ;;  %v3471_v59 = vld [vmem:[#allocation8 + $0x30] sm:$0xff]  }
 0x155   :  { %596 = vmatmul.mubr.bf16.vlgmr.msra.gmra.mrb[4].mxu0 %v3425_v57  ;;  %3233 = vmatpush3.bf16.msra.mxu1 %v3426_v58  ;;  %v3470_v57 = vld [vmem:[#allocation8 + $0x70] sm:$0xff]  }
 0x156   :  { %3027 = vmatpush3.bf16.msra.mxu0 %v3428_v60  ;;  %3234 = vmatprep.subr.bf16.mxu1 %v3830_v0  ;;  %v3469_v58 = vld [vmem:[#allocation9 + $0x30] sm:$0xff]   ;;  %v3473_v60 = vld [vmem:[#allocation8 + $0x78] sm:$0xff]  }
 0x157   :  { %3028 = vmatprep.subr.bf16.mxu0 %v3430_v61  ;;  %3248 = vmatprep.mubr.msk.bf16.mxu1 %vm3831_vm0, %v3830_v0  ;;  %v3472_v61 = vld [vmem:[#allocation9 + $0x38] sm:$0xff]  }
 0x159   :  { %3235 = vmatpush3.bf16.msra.mxu1 %v3429_v62  ;;  %v3474_v62 = vld [vmem:[#allocation8 + $0x38] sm:$0xff]  }
 0x15a   :  { %3029 = vmatpush3.bf16.msra.mxu0 %v3431_v63  ;;  %3236 = vmatprep.subr.bf16.mxu1 %v3830_v0 }
 0x15b   :  { %3030 = vmatprep.subr.bf16.mxu0 %v3433_v1 }
 0x15d   :  { %3237 = vmatpush3.bf16.msra.mxu1 %v3432_v2 }
 0x15e   :  { %3238 = vmatprep.subr.bf16.mxu1 %v3830_v0  ;;  %3031 = vmatpush3.bf16.msra.mxu0 %v3434_v3 }
 0x15f   :  { %3032 = vmatprep.subr.bf16.mxu0 %v3436_v5 }
 0x161   :  { %3239 = vmatpush3.bf16.msra.mxu1 %v3435_v4 }
 0x162   :  { %3033 = vmatpush3.bf16.msra.mxu0 %v3437_v6  ;;  %3240 = vmatprep.subr.bf16.mxu1 %v3830_v0 }
 0x163   :  { %3034 = vmatprep.subr.bf16.mxu0 %v3439_v8 }
 0x165   :  { %3241 = vmatpush3.bf16.msra.mxu1 %v3438_v7 }
 0x166   :  { %3035 = vmatpush3.bf16.msra.mxu0 %v3440_v9  ;;  %3242 = vmatprep.subr.bf16.mxu1 %v3830_v0 }
 0x167   :  { %3036 = vmatprep.subr.bf16.mxu0 %v3442_v11 }
 0x169   :  { %3243 = vmatpush3.bf16.msra.mxu1 %v3441_v10 }
 0x16a   :  { %3037 = vmatpush3.bf16.msra.mxu0 %v3443_v12  ;;  %3244 = vmatprep.subr.bf16.mxu1 %v3830_v0 }
 0x16b   :  { %3038 = vmatprep.subr.bf16.mxu0 %v3445_v13 }
 0x16d   :  { %3245 = vmatpush3.bf16.msra.mxu1 %v3444_v14 }
 0x16e   :  { %3039 = vmatpush3.bf16.msra.mxu0 %v3446_v15  ;;  %3246 = vmatprep.subr.bf16.mxu1 %v3830_v0 }
 0x16f   :  { %3040 = vmatprep.subr.bf16.mxu0 %v3448_v16  ;;  %v3475_v16 = vld [vmem:[#allocation3 + $0x18] sm:$0xff]  }
 0x171   :  { %3247 = vmatpush3.bf16.msra.mxu1 %v3447_v17 }
 0x172   :  { %3041 = vmatpush3.bf16.msra.mxu0 %v3449_v18  ;;  %3252 = vmatprep.subr.bf16.mxu1 %v3830_v0  ;;  %v3476_v18 = vld [vmem:[#allocation9] sm:$0xff]  }
 0x173   :  { %3057 = vmatprep.subr.bf16.mxu0 %v3452_v39  ;;  %v3495_v39 = vld [vmem:[#allocation8 + $0x70] sm:$0xff]  }
 0x227   :  { %v387_v20 = vpop.f32.mrb[0].mxu1 }
 0x228   :  { %v3975_v21 = vadd.f32 %v3972_v19, %v387_v20  ;;  %v3230_v22 = vpop.f32.mrb[1].mxu1  ;;  %v3011_v23 = vpop.f32.mrb[4].mxu0  ;;  %v3477_v20 = vld [vmem:[#allocation8 + $0x40] sm:$0xff]  }
 0x229   :  { %v390_v24 = vpop.f32.mrb[2].mxu1  ;;  %v3012_v25 = vpop.f32.mrb[5].mxu0  ;;  %v3478_v22 = vld [vmem:[#allocation8] sm:$0xff]  }
 0x22a   :  { %v3013_v26 = vadd.f32 %v3012_v25, %v3011_v23  ;;  %v3014_v27 = vpop.f32.mrb[6].mxu0  ;;  %394 = vmax.xlane.f32.xlu0 %v3975_v21  ;;  %v3231_v28 = vpop.f32.mrb[3].mxu1  ;;  %v3979_v30 = vadd.f32 %v3972_v19, %v390_v24  ;;  %v3480_v23 = vld [vmem:[#allocation8 + $0x48] sm:$0xff]  }
 0x22b   :  { %v3015_v29 = vpop.f32.mrb[7].mxu0  ;;  %v3479_v24 = vld [vmem:[#allocation9 + $0x8] sm:$0xff]   ;;  %v3484_v28 = vld [vmem:[#allocation8 + $0x10] sm:$0xff]  }
 0x22c   :  { %v598_v31 = vadd.f32 %v3013_v26, %v3955_v47  ;;  %v3016_v32 = vadd.f32 %v3015_v29, %v3014_v27  ;;  %v3481_v25 = vld [vmem:[#allocation8 + $0x8] sm:$0xff]   ;;  %v3483_v26 = vld [vmem:[#allocation8 + $0x50] sm:$0xff]   ;;  %v3485_v29 = vld [vmem:[#allocation9 + $0x18] sm:$0xff]  }
 0x22d   :  { %v3482_v27 = vld [vmem:[#allocation9 + $0x10] sm:$0xff]  }
 0x22e   :  { %v601_v33 = vadd.f32 %v3016_v32, %v3955_v47  ;;  %396 = vmax.xlane.f32.xlu0 %v3979_v30  ;;  %3588 = vtanh.f32 %v598_v31  ;;  %v3486_v31 = vld [vmem:[#allocation8 + $0x58] sm:$0xff]  }
 0x22f   :  { %v3487_v32 = vld [vmem:[#allocation8 + $0x18] sm:$0xff]  }
 0x230   :  { %3590 = vtanh.f32 %v601_v33  ;;  %v3488_v33 = vld [vmem:[#allocation9 + $0x20] sm:$0xff]  }
 0x238   :  { %v3589_v34 = vpop.eup %3588 }
 0x23a   :  { %v3591_v35 = vpop.eup %3590 }
 0x23b   :  { %v606_v37 = vpack.c.bf16 %v3591_v35, %v3589_v34  ;;  %v3489_v34 = vld [vmem:[#allocation8 + $0x60] sm:$0xff]  }
 0x23c   :  { %v3490_v35 = vld [vmem:[#allocation8 + $0x20] sm:$0xff]  }
 0x23d   :  { %3249 = vmatmul.mubr.bf16.vlgmr.msra.gmra.mrb[4].mxu1 %v606_v37  ;;  %922 = vmatprep.mubr.bf16.mxu0 %v606_v37  ;;  %v3492_v37 = vld [vmem:[#allocation8 + $0x68] sm:$0xff]  }
 0x23e   :  { %923 = vmatmul.mubr.bf16.vlgmr.msra.gmra.mrb[8].mxu0 %v3450_v36  ;;  %3268 = vmatprep.mubr.msk.bf16.mxu1 %vm3831_vm0, %v3830_v0  ;;  %v3491_v36 = vld [vmem:[#allocation9 + $0x28] sm:$0xff]  }
 0x23f   :  { %3253 = vmatpush3.bf16.msra.mxu1 %v3451_v38  ;;  %3058 = vmatpush3.bf16.msra.mxu0 %v3453_v40  ;;  %v3493_v38 = vld [vmem:[#allocation8 + $0x28] sm:$0xff]   ;;  %v3494_v40 = vld [vmem:[#allocation9 + $0x30] sm:$0xff]  }
 0x240   :  { %3254 = vmatprep.subr.bf16.mxu1 %v3830_v0  ;;  %3059 = vmatprep.subr.bf16.mxu0 %v3455_v41  ;;  %v3496_v41 = vld [vmem:[#allocation8 + $0x30] sm:$0xff]  }
 0x243   :  { %3255 = vmatpush3.bf16.msra.mxu1 %v3454_v42  ;;  %3060 = vmatpush3.bf16.msra.mxu0 %v3456_v43  ;;  %v3498_v42 = vld [vmem:[#allocation8 + $0x78] sm:$0xff]  }
 0x244   :  { %3256 = vmatprep.subr.bf16.mxu1 %v3830_v0  ;;  %3061 = vmatprep.subr.bf16.mxu0 %v3458_v44  ;;  %v3497_v43 = vld [vmem:[#allocation9 + $0x38] sm:$0xff]  }
 0x245   :  { %v3499_v44 = vld [vmem:[#allocation8 + $0x38] sm:$0xff]  }
 0x247   :  { %3257 = vmatpush3.bf16.msra.mxu1 %v3457_v45  ;;  %3062 = vmatpush3.bf16.msra.mxu0 %v3459_v46 }
 0x248   :  { %3258 = vmatprep.subr.bf16.mxu1 %v3830_v0  ;;  %3063 = vmatprep.subr.bf16.mxu0 %v3461_v49 }
 0x24b   :  { %3259 = vmatpush3.bf16.msra.mxu1 %v3460_v48  ;;  %3064 = vmatpush3.bf16.msra.mxu0 %v3462_v50 }
 0x24c   :  { %3260 = vmatprep.subr.bf16.mxu1 %v3830_v0  ;;  %3065 = vmatprep.subr.bf16.mxu0 %v3464_v52 }
 0x24f   :  { %3261 = vmatpush3.bf16.msra.mxu1 %v3463_v51  ;;  %3066 = vmatpush3.bf16.msra.mxu0 %v3465_v53 }
 0x250   :  { %3262 = vmatprep.subr.bf16.mxu1 %v3830_v0  ;;  %3067 = vmatprep.subr.bf16.mxu0 %v3467_v55 }
 0x253   :  { %3263 = vmatpush3.bf16.msra.mxu1 %v3466_v54  ;;  %3068 = vmatpush3.bf16.msra.mxu0 %v3468_v56 }
 0x254   :  { %3264 = vmatprep.subr.bf16.mxu1 %v3830_v0  ;;  %3069 = vmatprep.subr.bf16.mxu0 %v3470_v57 }
 0x257   :  { %3265 = vmatpush3.bf16.msra.mxu1 %v3469_v58  ;;  %3070 = vmatpush3.bf16.msra.mxu0 %v3471_v59 }
 0x258   :  { %3266 = vmatprep.subr.bf16.mxu1 %v3830_v0  ;;  %3071 = vmatprep.subr.bf16.mxu0 %v3473_v60 }
 0x25b   :  { %3267 = vmatpush3.bf16.msra.mxu1 %v3472_v61  ;;  %3072 = vmatpush3.bf16.msra.mxu0 %v3474_v62  ;;  %v3500_v62 = vld [vmem:[#allocation3 + $0x20] sm:$0xff]  }
 0x25c   :  { %3272 = vmatprep.subr.bf16.mxu1 %v3830_v0  ;;  %3088 = vmatprep.subr.bf16.mxu0 %v3477_v20  ;;  %v3518_v20 = vld [vmem:[#allocation8 + $0x28] sm:$0xff]  }
 0x310   :  { %v713_v63 = vpop.f32.mrb[4].mxu1 }
 0x311   :  { %v3995_v1 = vadd.f32 %v3972_v19, %v713_v63  ;;  %v3250_v2 = vpop.f32.mrb[5].mxu1  ;;  %v3042_v3 = vpop.f32.mrb[8].mxu0 }
 0x312   :  { %v716_v4 = vpop.f32.mrb[6].mxu1  ;;  %v3043_v5 = vpop.f32.mrb[9].mxu0  ;;  %v3501_v2 = vld [vmem:[#allocation9] sm:$0xff]  }
 0x313   :  { %v3044_v6 = vadd.f32 %v3043_v5, %v3042_v3  ;;  %v3045_v7 = vpop.f32.mrb[10].mxu0  ;;  %720 = vmax.xlane.f32.xlu1 %v3995_v1  ;;  %v3251_v8 = vpop.f32.mrb[7].mxu1  ;;  %v3999_v10 = vadd.f32 %v3972_v19, %v716_v4  ;;  %v3502_v3 = vld [vmem:[#allocation8 + $0x40] sm:$0xff]   ;;  %v3505_v5 = vld [vmem:[#allocation8 + $0x48] sm:$0xff]  }
 0x314   :  { %v3046_v9 = vpop.f32.mrb[11].mxu0  ;;  %v3503_v4 = vld [vmem:[#allocation8] sm:$0xff]   ;;  %v3507_v8 = vld [vmem:[#allocation9 + $0x10] sm:$0xff]  }
 0x315   :  { %v925_v11 = vadd.f32 %v3044_v6, %v3955_v47  ;;  %v3047_v12 = vadd.f32 %v3046_v9, %v3045_v7  ;;  %v3504_v6 = vld [vmem:[#allocation9 + $0x8] sm:$0xff]   ;;  %v3508_v7 = vld [vmem:[#allocation8 + $0x50] sm:$0xff]  }
 0x316   :  { %v3509_v9 = vld [vmem:[#allocation8 + $0x10] sm:$0xff]  }
 0x317   :  { %v928_v13 = vadd.f32 %v3047_v12, %v3955_v47  ;;  %722 = vmax.xlane.f32.xlu1 %v3999_v10  ;;  %3592 = vtanh.f32 %v925_v11  ;;  %v3510_v11 = vld [vmem:[#allocation9 + $0x18] sm:$0xff]  }
 0x318   :  { %v3511_v12 = vld [vmem:[#allocation8 + $0x58] sm:$0xff]  }
 0x319   :  { %3594 = vtanh.f32 %v928_v13  ;;  %v3512_v13 = vld [vmem:[#allocation8 + $0x18] sm:$0xff]  }
 0x321   :  { %v3593_v14 = vpop.eup %3592 }
 0x323   :  { %v3595_v15 = vpop.eup %3594 }
 0x324   :  { %v933_v17 = vpack.c.bf16 %v3595_v15, %v3593_v14  ;;  %v3513_v14 = vld [vmem:[#allocation9 + $0x20] sm:$0xff]  }
 0x325   :  { %v3514_v15 = vld [vmem:[#allocation8 + $0x60] sm:$0xff]  }
 0x326   :  { %3269 = vmatmul.mubr.bf16.vlgmr.msra.gmra.mrb[8].mxu1 %v933_v17  ;;  %1249 = vmatprep.mubr.bf16.mxu0 %v933_v17  ;;  %v3516_v17 = vld [vmem:[#allocation9 + $0x28] sm:$0xff]  }
 0x327   :  { %1250 = vmatmul.mubr.bf16.vlgmr.msra.gmra.mrb[12].mxu0 %v3475_v16  ;;  %3288 = vmatprep.mubr.msk.bf16.mxu1 %vm3831_vm0, %v3830_v0  ;;  %v3515_v16 = vld [vmem:[#allocation8 + $0x20] sm:$0xff]  }
 0x328   :  { %3273 = vmatpush3.bf16.msra.mxu1 %v3476_v18  ;;  %3089 = vmatpush3.bf16.msra.mxu0 %v3478_v22  ;;  %v3517_v18 = vld [vmem:[#allocation8 + $0x68] sm:$0xff]   ;;  %v3520_v22 = vld [vmem:[#allocation8 + $0x70] sm:$0xff]  }
 0x329   :  { %3274 = vmatprep.subr.bf16.mxu1 %v3830_v0  ;;  %3090 = vmatprep.subr.bf16.mxu0 %v3480_v23  ;;  %v3519_v23 = vld [vmem:[#allocation9 + $0x30] sm:$0xff]  }
 0x32c   :  { %3275 = vmatpush3.bf16.msra.mxu1 %v3479_v24  ;;  %3091 = vmatpush3.bf16.msra.mxu0 %v3481_v25  ;;  %v3521_v24 = vld [vmem:[#allocation8 + $0x30] sm:$0xff]   ;;  %v3523_v25 = vld [vmem:[#allocation8 + $0x78] sm:$0xff]  }
 0x32d   :  { %3276 = vmatprep.subr.bf16.mxu1 %v3830_v0  ;;  %3092 = vmatprep.subr.bf16.mxu0 %v3483_v26  ;;  %v3522_v26 = vld [vmem:[#allocation9 + $0x38] sm:$0xff]  }
 0x330   :  { %3277 = vmatpush3.bf16.msra.mxu1 %v3482_v27  ;;  %3093 = vmatpush3.bf16.msra.mxu0 %v3484_v28  ;;  %v3524_v27 = vld [vmem:[#allocation8 + $0x38] sm:$0xff]  }
 0x331   :  { %3278 = vmatprep.subr.bf16.mxu1 %v3830_v0  ;;  %3094 = vmatprep.subr.bf16.mxu0 %v3486_v31 }
 0x334   :  { %3279 = vmatpush3.bf16.msra.mxu1 %v3485_v29  ;;  %3095 = vmatpush3.bf16.msra.mxu0 %v3487_v32 }
 0x335   :  { %3280 = vmatprep.subr.bf16.mxu1 %v3830_v0  ;;  %3096 = vmatprep.subr.bf16.mxu0 %v3489_v34  ;;  %v4040_v34 = vld [vmem:[%s4234_s3] ss:$0 sm:$0xff] }
 0x338   :  { %3281 = vmatpush3.bf16.msra.mxu1 %v3488_v33  ;;  %3097 = vmatpush3.bf16.msra.mxu0 %v3490_v35 }
 0x339   :  { %3282 = vmatprep.subr.bf16.mxu1 %v3830_v0  ;;  %3098 = vmatprep.subr.bf16.mxu0 %v3492_v37 }
 0x33c   :  { %3283 = vmatpush3.bf16.msra.mxu1 %v3491_v36  ;;  %3099 = vmatpush3.bf16.msra.mxu0 %v3493_v38 }
 0x33d   :  { %3284 = vmatprep.subr.bf16.mxu1 %v3830_v0  ;;  %3100 = vmatprep.subr.bf16.mxu0 %v3495_v39 }
 0x340   :  { %3285 = vmatpush3.bf16.msra.mxu1 %v3494_v40  ;;  %3101 = vmatpush3.bf16.msra.mxu0 %v3496_v41 }
 0x341   :  { %3286 = vmatprep.subr.bf16.mxu1 %v3830_v0  ;;  %3102 = vmatprep.subr.bf16.mxu0 %v3498_v42 }
 0x344   :  { %3287 = vmatpush3.bf16.msra.mxu1 %v3497_v43  ;;  %3103 = vmatpush3.bf16.msra.mxu0 %v3499_v44 }
 0x345   :  { %3292 = vmatprep.subr.bf16.mxu1 %v3830_v0  ;;  %3119 = vmatprep.subr.bf16.mxu0 %v3502_v3  ;;  %v3541_v3 = vld [vmem:[#allocation9 + $0x28] sm:$0xff]  }
 0x3f9   :  { %v1040_v45 = vpop.f32.mrb[8].mxu1 }
 0x3fa   :  { %v4015_v46 = vadd.f32 %v3972_v19, %v1040_v45  ;;  %v3270_v48 = vpop.f32.mrb[9].mxu1  ;;  %v3073_v49 = vpop.f32.mrb[12].mxu0 }
 0x3fb   :  { %v1043_v50 = vpop.f32.mrb[10].mxu1  ;;  %v3074_v51 = vpop.f32.mrb[13].mxu0  ;;  %v3525_v48 = vld [vmem:[#allocation3 + $0x28] sm:$0xff]  }
 0x3fc   :  { %v4018_v52 = vadd.f32 %v3972_v19, %v1043_v50  ;;  %v3075_v53 = vadd.f32 %v3074_v51, %v3073_v49  ;;  %v3076_v54 = vpop.f32.mrb[14].mxu0  ;;  %1047 = vmax.xlane.f32.xlu0 %v4015_v46  ;;  %v3271_v55 = vpop.f32.mrb[11].mxu1  ;;  %v3526_v49 = vld [vmem:[#allocation9] sm:$0xff]  }
 0x3fd   :  { %v3077_v56 = vpop.f32.mrb[15].mxu0  ;;  %v3527_v50 = vld [vmem:[#allocation8 + $0x40] sm:$0xff]   ;;  %v3531_v55 = vld [vmem:[#allocation8 + $0x8] sm:$0xff]  }
 0x3fe   :  { %v1252_v57 = vadd.f32 %v3075_v53, %v3955_v47  ;;  %v3078_v58 = vadd.f32 %v3077_v56, %v3076_v54  ;;  %1049 = vmax.xlane.f32.xlu1 %v4018_v52  ;;  %v3528_v51 = vld [vmem:[#allocation8] sm:$0xff]   ;;  %v3530_v53 = vld [vmem:[#allocation8 + $0x48] sm:$0xff]   ;;  %v3533_v56 = vld [vmem:[#allocation8 + $0x50] sm:$0xff]  }
 0x3ff   :  { %v3529_v54 = vld [vmem:[#allocation9 + $0x8] sm:$0xff]  }
 0x400   :  { %v1255_v59 = vadd.f32 %v3078_v58, %v3955_v47  ;;  %3596 = vtanh.f32 %v1252_v57  ;;  %v3506_v47 = vld [vmem:[#allocation8 + $0x8] sm:$0xff]   ;;  %v3532_v57 = vld [vmem:[#allocation9 + $0x10] sm:$0xff]  }
 0x401   :  { %v3534_v58 = vld [vmem:[#allocation8 + $0x10] sm:$0xff]  }
 0x402   :  { %3598 = vtanh.f32 %v1255_v59  ;;  %v3535_v59 = vld [vmem:[#allocation9 + $0x18] sm:$0xff]  }
 0x40a   :  { %v3597_v60 = vpop.eup %3596 }
 0x40c   :  { %v3599_v61 = vpop.eup %3598 }
 0x40d   :  { %v1260_v63 = vpack.c.bf16 %v3599_v61, %v3597_v60  ;;  %v3536_v60 = vld [vmem:[#allocation8 + $0x58] sm:$0xff]  }
 0x40e   :  { %v3537_v61 = vld [vmem:[#allocation8 + $0x18] sm:$0xff]  }
 0x40f   :  { %3289 = vmatmul.mubr.bf16.vlgmr.msra.gmra.mrb[12].mxu1 %v1260_v63  ;;  %1576 = vmatprep.mubr.bf16.mxu0 %v1260_v63  ;;  %v3539_v63 = vld [vmem:[#allocation8 + $0x60] sm:$0xff]  }
 0x410   :  { %1577 = vmatmul.mubr.bf16.vlgmr.msra.gmra.mrb[16].mxu0 %v3500_v62  ;;  %3308 = vmatprep.mubr.msk.bf16.mxu1 %vm3831_vm0, %v3830_v0  ;;  %v3538_v62 = vld [vmem:[#allocation9 + $0x20] sm:$0xff]  }
 0x411   :  { %3293 = vmatpush3.bf16.msra.mxu1 %v3501_v2  ;;  %3120 = vmatpush3.bf16.msra.mxu0 %v3503_v4  ;;  %v3540_v2 = vld [vmem:[#allocation8 + $0x20] sm:$0xff]   ;;  %v3542_v4 = vld [vmem:[#allocation8 + $0x68] sm:$0xff]  }
 0x412   :  { %3294 = vmatprep.subr.bf16.mxu1 %v3830_v0  ;;  %3121 = vmatprep.subr.bf16.mxu0 %v3505_v5  ;;  %v3543_v5 = vld [vmem:[#allocation8 + $0x28] sm:$0xff]  }
 0x415   :  { %3295 = vmatpush3.bf16.msra.mxu1 %v3504_v6  ;;  %3122 = vmatpush3.bf16.msra.mxu0 %v3506_v47  ;;  %v3545_v6 = vld [vmem:[#allocation8 + $0x70] sm:$0xff]  }
 0x416   :  { %3296 = vmatprep.subr.bf16.mxu1 %v3830_v0  ;;  %3123 = vmatprep.subr.bf16.mxu0 %v3508_v7  ;;  %v3544_v47 = vld [vmem:[#allocation9 + $0x30] sm:$0xff]  }
 0x417   :  { %v3546_v7 = vld [vmem:[#allocation8 + $0x30] sm:$0xff]  }
 0x419   :  { %3297 = vmatpush3.bf16.msra.mxu1 %v3507_v8  ;;  %3124 = vmatpush3.bf16.msra.mxu0 %v3509_v9  ;;  %v3548_v8 = vld [vmem:[#allocation8 + $0x78] sm:$0xff]  }
 0x41a   :  { %3298 = vmatprep.subr.bf16.mxu1 %v3830_v0  ;;  %3125 = vmatprep.subr.bf16.mxu0 %v3511_v12  ;;  %v3547_v9 = vld [vmem:[#allocation9 + $0x38] sm:$0xff]   ;;  %v4062_v12 = vld [vmem:[%s4236_s5] ss:$0 sm:$0xff]  ;;  %s3832_s5 = smov [#allocation12]  }
 0x41b   :  { %s2730_s13 = sshll.u32 %s3832_s5, 4  ;;  %s2731_s13 = int_to_ptr.vmem [resolvable:$true] %s2730_s13 }
 0x41c   :  { %s3768_s14 = scalar_lea.vmem %s2731_s13, 256  ;;  %p3773_p5 = scmp.lt.s32.totalorder %s2731_s13, %s2731_s13 }
 0x41d   :  { %3299 = vmatpush3.bf16.msra.mxu1 %v3510_v11  ;;  %3126 = vmatpush3.bf16.msra.mxu0 %v3512_v13  ;;  %v3549_v11 = vld [vmem:[#allocation8 + $0x38] sm:$0xff]   ;;  %p3769_p4 = scmp.ne.s32.totalorder %s2731_s13, %s3768_s14  ;;  %p3774_p6 = scmp.lt.s32.totalorder %s3768_s14, %s3768_s14 }
 0x41e   :  { %3300 = vmatprep.subr.bf16.mxu1 %v3830_v0  ;;  %3127 = vmatprep.subr.bf16.mxu0 %v3514_v15 }
 0x41f   :  { %p3775_p7 = por %p3774_p6, %p3773_p5 }
 0x421   :  { %3301 = vmatpush3.bf16.msra.mxu1 %v3513_v14  ;;  %3128 = vmatpush3.bf16.msra.mxu0 %v3515_v16  ;;  %p3776_p8 = pnand %p3775_p7, %p3769_p4 }
 0x422   :  { %3302 = vmatprep.subr.bf16.mxu1 %v3830_v0  ;;  %3129 = vmatprep.subr.bf16.mxu0 %v3517_v18 }
 0x425   :  { %3303 = vmatpush3.bf16.msra.mxu1 %v3516_v17  ;;  %3130 = vmatpush3.bf16.msra.mxu0 %v3518_v20 }
 0x426   :  { %3304 = vmatprep.subr.bf16.mxu1 %v3830_v0  ;;  %3131 = vmatprep.subr.bf16.mxu0 %v3520_v22 }
 0x429   :  { %3305 = vmatpush3.bf16.msra.mxu1 %v3519_v23  ;;  %3132 = vmatpush3.bf16.msra.mxu0 %v3521_v24 }
 0x42a   :  { %3306 = vmatprep.subr.bf16.mxu1 %v3830_v0  ;;  %3133 = vmatprep.subr.bf16.mxu0 %v3523_v25 }
 0x42d   :  { %3307 = vmatpush3.bf16.msra.mxu1 %v3522_v26  ;;  %3134 = vmatpush3.bf16.msra.mxu0 %v3524_v27 }
 0x42e   :  { %3312 = vmatprep.subr.bf16.mxu1 %v3830_v0  ;;  %3150 = vmatprep.subr.bf16.mxu0 %v3527_v50  ;;  %v3563_v50 = vld [vmem:[#allocation9 + $0x20] sm:$0xff]  }
 0x4e2   :  { %v1367_v28 = vpop.f32.mrb[12].mxu1 }
 0x4e3   :  { %v4035_v29 = vadd.f32 %v3972_v19, %v1367_v28  ;;  %v3290_v31 = vpop.f32.mrb[13].mxu1  ;;  %v3104_v32 = vpop.f32.mrb[16].mxu0 }
 0x4e4   :  { %v1370_v33 = vpop.f32.mrb[14].mxu1  ;;  %v3105_v35 = vpop.f32.mrb[17].mxu0 }
 0x4e5   :  { %v4043_v36 = vadd.f32 %v3972_v19, %v1370_v33  ;;  %v3106_v37 = vadd.f32 %v3105_v35, %v3104_v32  ;;  %v3107_v38 = vpop.f32.mrb[18].mxu0  ;;  %1374 = vmax.xlane.f32.xlu0 %v4035_v29  ;;  %v3291_v39 = vpop.f32.mrb[15].mxu1  ;;  %v3550_v33 = vld [vmem:[#allocation3 + $0x30] sm:$0xff]  }
 0x4e6   :  { %v3108_v40 = vpop.f32.mrb[19].mxu0  ;;  %v3553_v39 = vld [vmem:[#allocation8] sm:$0xff]  }
 0x4e7   :  { %v1579_v41 = vadd.f32 %v3106_v37, %v4040_v34  ;;  %v3109_v42 = vadd.f32 %v3108_v40, %v3107_v38  ;;  %1376 = vmax.xlane.f32.xlu1 %v4043_v36  ;;  %v3551_v37 = vld [vmem:[#allocation9] sm:$0xff]   ;;  %v3555_v40 = vld [vmem:[#allocation8 + $0x48] sm:$0xff]  }
 0x4e8   :  { %v3552_v38 = vld [vmem:[#allocation8 + $0x40] sm:$0xff]  }
 0x4e9   :  { %v1582_v43 = vadd.f32 %v3109_v42, %v4040_v34  ;;  %3600 = vtanh.f32 %v1579_v41  ;;  %v3554_v41 = vld [vmem:[#allocation9 + $0x8] sm:$0xff]  }
 0x4ea   :  { %v3556_v42 = vld [vmem:[#allocation8 + $0x8] sm:$0xff]  }
 0x4eb   :  { %3602 = vtanh.f32 %v1582_v43  ;;  %v3558_v43 = vld [vmem:[#allocation8 + $0x50] sm:$0xff]  }
 0x4f3   :  { %v3601_v44 = vpop.eup %3600 }
 0x4f5   :  { %v3603_v45 = vpop.eup %3602 }
 0x4f6   :  { %v1587_v19 = vpack.c.bf16 %v3603_v45, %v3601_v44  ;;  %v3557_v44 = vld [vmem:[#allocation9 + $0x10] sm:$0xff]  }
 0x4f7   :  { %v3559_v45 = vld [vmem:[#allocation8 + $0x10] sm:$0xff]  }
 0x4f8   :  { %3309 = vmatmul.mubr.bf16.vlgmr.msra.gmra.mrb[16].mxu1 %v1587_v19  ;;  %1903 = vmatprep.mubr.bf16.mxu0 %v1587_v19  ;;  %v3561_v19 = vld [vmem:[#allocation8 + $0x58] sm:$0xff]  }
 0x4f9   :  { %1904 = vmatmul.mubr.bf16.vlgmr.msra.gmra.mrb[20].mxu0 %v3525_v48  ;;  %3328 = vmatprep.mubr.msk.bf16.mxu1 %vm3831_vm0, %v3830_v0  ;;  %v3560_v48 = vld [vmem:[#allocation9 + $0x18] sm:$0xff]  }
 0x4fa   :  { %3313 = vmatpush3.bf16.msra.mxu1 %v3526_v49  ;;  %3151 = vmatpush3.bf16.msra.mxu0 %v3528_v51  ;;  %v3562_v49 = vld [vmem:[#allocation8 + $0x18] sm:$0xff]   ;;  %v3564_v51 = vld [vmem:[#allocation8 + $0x60] sm:$0xff]  }
 0x4fb   :  { %3314 = vmatprep.subr.bf16.mxu1 %v3830_v0  ;;  %3152 = vmatprep.subr.bf16.mxu0 %v3530_v53  ;;  %v3565_v53 = vld [vmem:[#allocation8 + $0x20] sm:$0xff]  }
 0x4fe   :  { %3315 = vmatpush3.bf16.msra.mxu1 %v3529_v54  ;;  %3153 = vmatpush3.bf16.msra.mxu0 %v3531_v55  ;;  %v3566_v54 = vld [vmem:[#allocation9 + $0x28] sm:$0xff]  }
 0x4ff   :  { %3316 = vmatprep.subr.bf16.mxu1 %v3830_v0  ;;  %3154 = vmatprep.subr.bf16.mxu0 %v3533_v56  ;;  %v3567_v55 = vld [vmem:[#allocation8 + $0x68] sm:$0xff]  }
 0x500   :  { %v3568_v56 = vld [vmem:[#allocation8 + $0x28] sm:$0xff]  }
 0x502   :  { %3317 = vmatpush3.bf16.msra.mxu1 %v3532_v57  ;;  %3155 = vmatpush3.bf16.msra.mxu0 %v3534_v58  ;;  %v3570_v57 = vld [vmem:[#allocation8 + $0x70] sm:$0xff]  }
 0x503   :  { %3318 = vmatprep.subr.bf16.mxu1 %v3830_v0  ;;  %3156 = vmatprep.subr.bf16.mxu0 %v3536_v60  ;;  %v3569_v58 = vld [vmem:[#allocation9 + $0x30] sm:$0xff]   ;;  %v3573_v60 = vld [vmem:[#allocation8 + $0x78] sm:$0xff]  }
 0x506   :  { %3319 = vmatpush3.bf16.msra.mxu1 %v3535_v59  ;;  %3157 = vmatpush3.bf16.msra.mxu0 %v3537_v61  ;;  %v3571_v59 = vld [vmem:[#allocation8 + $0x30] sm:$0xff]   ;;  %v3572_v61 = vld [vmem:[#allocation9 + $0x38] sm:$0xff]  }
 0x507   :  { %3320 = vmatprep.subr.bf16.mxu1 %v3830_v0  ;;  %3158 = vmatprep.subr.bf16.mxu0 %v3539_v63 }
 0x50a   :  { %3321 = vmatpush3.bf16.msra.mxu1 %v3538_v62  ;;  %3159 = vmatpush3.bf16.msra.mxu0 %v3540_v2  ;;  %v3574_v62 = vld [vmem:[#allocation8 + $0x38] sm:$0xff]  }
 0x50b   :  { %3322 = vmatprep.subr.bf16.mxu1 %v3830_v0  ;;  %3160 = vmatprep.subr.bf16.mxu0 %v3542_v4 }
 0x50e   :  { %3323 = vmatpush3.bf16.msra.mxu1 %v3541_v3  ;;  %3161 = vmatpush3.bf16.msra.mxu0 %v3543_v5 }
 0x50f   :  { %3324 = vmatprep.subr.bf16.mxu1 %v3830_v0  ;;  %3162 = vmatprep.subr.bf16.mxu0 %v3545_v6 }
 0x512   :  { %3325 = vmatpush3.bf16.msra.mxu1 %v3544_v47  ;;  %3163 = vmatpush3.bf16.msra.mxu0 %v3546_v7 }
 0x513   :  { %3326 = vmatprep.subr.bf16.mxu1 %v3830_v0  ;;  %3164 = vmatprep.subr.bf16.mxu0 %v3548_v8 }
 0x516   :  { %3327 = vmatpush3.bf16.msra.mxu1 %v3547_v9  ;;  %3165 = vmatpush3.bf16.msra.mxu0 %v3549_v11 }
 0x517   :  { %3332 = vmatprep.subr.bf16.mxu1 %v3830_v0  ;;  %3181 = vmatprep.subr.bf16.mxu0 %v3552_v38 }
 0x5cb   :  { %v1694_v13 = vpop.f32.mrb[16].mxu1 }
 0x5cc   :  { %v4065_v14 = vadd.f32 %v4062_v12, %v1694_v13  ;;  %v3310_v15 = vpop.f32.mrb[17].mxu1  ;;  %v3135_v16 = vpop.f32.mrb[20].mxu0 }
 0x5cd   :  { %v1697_v17 = vpop.f32.mrb[18].mxu1  ;;  %v3136_v18 = vpop.f32.mrb[21].mxu0 }
 0x5ce   :  { %v4068_v20 = vadd.f32 %v4062_v12, %v1697_v17  ;;  %v3137_v22 = vadd.f32 %v3136_v18, %v3135_v16  ;;  %v3138_v23 = vpop.f32.mrb[22].mxu0  ;;  %1701 = vmax.xlane.f32.xlu0 %v4065_v14  ;;  %v3311_v24 = vpop.f32.mrb[19].mxu1 }
 0x5cf   :  { %v3139_v25 = vpop.f32.mrb[23].mxu0  ;;  %v3576_v24 = vld [vmem:[#allocation9] sm:$0xff]  }
 0x5d0   :  { %v1906_v26 = vadd.f32 %v3137_v22, %v4040_v34  ;;  %v3140_v27 = vadd.f32 %v3139_v25, %v3138_v23  ;;  %1703 = vmax.xlane.f32.xlu1 %v4068_v20  ;;  %v3575_v22 = vld [vmem:[#allocation3 + $0x38] sm:$0xff]  }
 0x5d1   :  { %v3577_v25 = vld [vmem:[#allocation9 + $0x8] sm:$0xff]  }
 0x5d2   :  { %v1909_v28 = vadd.f32 %v3140_v27, %v4040_v34  ;;  %3604 = vtanh.f32 %v1906_v26  ;;  %v3578_v26 = vld [vmem:[#allocation9 + $0x10] sm:$0xff]   ;;  %v3579_v27 = vld [vmem:[#allocation9 + $0x18] sm:$0xff]  }
 0x5d4   :  { %3606 = vtanh.f32 %v1909_v28  ;;  %v3580_v28 = vld [vmem:[#allocation9 + $0x20] sm:$0xff]  }
 0x5dc   :  { %v3605_v31 = vpop.eup %3604 }
 0x5de   :  { %v3607_v32 = vpop.eup %3606 }
 0x5df   :  { %v1914_v35 = vpack.c.bf16 %v3607_v32, %v3605_v31  ;;  %v3581_v31 = vld [vmem:[#allocation9 + $0x28] sm:$0xff]   ;;  %v3582_v32 = vld [vmem:[#allocation9 + $0x30] sm:$0xff]  }
 0x5e1   :  { %3329 = vmatmul.mubr.bf16.vlgmr.msra.gmra.mrb[20].mxu1 %v1914_v35  ;;  %2230 = vmatprep.mubr.bf16.mxu0 %v1914_v35 }
 0x5e2   :  { %2231 = vmatmul.mubr.bf16.vlgmr.msra.gmra.mrb[24].mxu0 %v3550_v33  ;;  %3348 = vmatprep.mubr.msk.bf16.mxu1 %vm3831_vm0, %v3830_v0  ;;  %v3583_v33 = vld [vmem:[#allocation9 + $0x38] sm:$0xff]  }
 0x5e3   :  { %3333 = vmatpush3.bf16.msra.mxu1 %v3551_v37  ;;  %3182 = vmatpush3.bf16.msra.mxu0 %v3553_v39 }
 0x5e4   :  { %3334 = vmatprep.subr.bf16.mxu1 %v3830_v0  ;;  %3183 = vmatprep.subr.bf16.mxu0 %v3555_v40 }
 0x5e7   :  { %3335 = vmatpush3.bf16.msra.mxu1 %v3554_v41  ;;  %3184 = vmatpush3.bf16.msra.mxu0 %v3556_v42 }
 0x5e8   :  { %3336 = vmatprep.subr.bf16.mxu1 %v3830_v0  ;;  %3185 = vmatprep.subr.bf16.mxu0 %v3558_v43 }
 0x5eb   :  { %3337 = vmatpush3.bf16.msra.mxu1 %v3557_v44  ;;  %3186 = vmatpush3.bf16.msra.mxu0 %v3559_v45 }
 0x5ec   :  { %3338 = vmatprep.subr.bf16.mxu1 %v3830_v0  ;;  %3187 = vmatprep.subr.bf16.mxu0 %v3561_v19 }
 0x5ef   :  { %3339 = vmatpush3.bf16.msra.mxu1 %v3560_v48  ;;  %3188 = vmatpush3.bf16.msra.mxu0 %v3562_v49 }
 0x5f0   :  { %3340 = vmatprep.subr.bf16.mxu1 %v3830_v0  ;;  %3189 = vmatprep.subr.bf16.mxu0 %v3564_v51 }
 0x5f3   :  { %3341 = vmatpush3.bf16.msra.mxu1 %v3563_v50  ;;  %3190 = vmatpush3.bf16.msra.mxu0 %v3565_v53 }
 0x5f4   :  { %3342 = vmatprep.subr.bf16.mxu1 %v3830_v0  ;;  %3191 = vmatprep.subr.bf16.mxu0 %v3567_v55 }
 0x5f7   :  { %3343 = vmatpush3.bf16.msra.mxu1 %v3566_v54  ;;  %3192 = vmatpush3.bf16.msra.mxu0 %v3568_v56  ;;  %v395_v56 = vpop.xlane.xlu0 %394 }
 0x5f8   :  { %3344 = vmatprep.subr.bf16.mxu1 %v3830_v0  ;;  %3193 = vmatprep.subr.bf16.mxu0 %v3570_v57  ;;  %v721_v57 = vpop.xlane.xlu1 %720 }
 0x5fb   :  { %3345 = vmatpush3.bf16.msra.mxu1 %v3569_v58  ;;  %3194 = vmatpush3.bf16.msra.mxu0 %v3571_v59  ;;  %v397_v58 = vpop.xlane.xlu0 %396  ;;  %v4114_v59 = vsub.f32 %v3975_v21, %v395_v56 }
 0x5fc   :  { %3346 = vmatprep.subr.bf16.mxu1 %v3830_v0  ;;  %3195 = vmatprep.subr.bf16.mxu0 %v3573_v60  ;;  %v4117_v60 = vsub.f32 %v3979_v30, %v397_v58 }
 0x5ff   :  { %3347 = vmatpush3.bf16.msra.mxu1 %v3572_v61  ;;  %3196 = vmatpush3.bf16.msra.mxu0 %v3574_v62  ;;  %v400_v61 = vmul.f32 1.442695, %v4114_v59  ;;  %v4121_v62 = vsub.f32 %v3995_v1, %v721_v57 }
 0x600   :  { %3352 = vmatprep.subr.bf16.mxu1 %v3830_v0 }
 0x601   :  { %v726_v21 = vmul.f32 1.442695, %v4121_v62 }
 0x6b4   :  { %v2021_v63 = vpop.f32.mrb[20].mxu1 }
 0x6b5   :  { %v4085_v2 = vadd.f32 %v4062_v12, %v2021_v63  ;;  %v3330_v3 = vpop.f32.mrb[21].mxu1  ;;  %v3166_v4 = vpop.f32.mrb[24].mxu0 }
 0x6b6   :  { %v2024_v5 = vpop.f32.mrb[22].mxu1  ;;  %v3167_v6 = vpop.f32.mrb[25].mxu0  ;;  %v402_v3 = vmul.f32 1.442695, %v4117_v60 }
 0x6b7   :  { %v4088_v47 = vadd.f32 %v4062_v12, %v2024_v5  ;;  %v3168_v7 = vadd.f32 %v3167_v6, %v3166_v4  ;;  %v3169_v8 = vpop.f32.mrb[26].mxu0  ;;  %2028 = vmax.xlane.f32.xlu0 %v4085_v2  ;;  %v3331_v9 = vpop.f32.mrb[23].mxu1 }
 0x6b8   :  { %v3170_v11 = vpop.f32.mrb[27].mxu0  ;;  %v1048_v63 = vpop.xlane.xlu0 %1047 }
 0x6b9   :  { %v2233_v13 = vadd.f32 %v3168_v7, %v4040_v34  ;;  %v3171_v15 = vadd.f32 %v3170_v11, %v3169_v8  ;;  %2030 = vmax.xlane.f32.xlu1 %v4088_v47  ;;  %v4129_v6 = vsub.f32 %v4015_v46, %v1048_v63 }
 0x6bb   :  { %v2236_v16 = vadd.f32 %v3171_v15, %v4040_v34  ;;  %3608 = vtanh.f32 %v2233_v13  ;;  %v1053_v9 = vmul.f32 1.442695, %v4129_v6 }
 0x6bc   :  { %v1375_v30 = vpop.xlane.xlu0 %1374 }
 0x6bd   :  { %3610 = vtanh.f32 %v2236_v16 }
 0x6c0   :  { %v1702_v13 = vpop.xlane.xlu0 %1701 }
 0x6c5   :  { %v3609_v17 = vpop.eup %3608 }
 0x6c7   :  { %v3611_v18 = vpop.eup %3610 }
 0x6c8   :  { %v2241_v23 = vpack.c.bf16 %v3611_v18, %v3609_v17 }
 0x6ca   :  { %3349 = vmatmul.mubr.bf16.vlgmr.msra.gmra.mrb[24].mxu1 %v2241_v23  ;;  %2557 = vmatprep.mubr.bf16.mxu0 %v2241_v23 }
 0x6cb   :  { %2558 = vmatmul.mubr.bf16.vlgmr.msra.gmra.mrb[28].mxu0 %v3575_v22  ;;  %3368 = vmatprep.mubr.msk.bf16.mxu1 %vm3831_vm0, %v3830_v0 }
 0x6cc   :  { %3353 = vmatpush3.bf16.msra.mxu1 %v3576_v24  ;;  %v4152_v24 = vsub.f32 %v4065_v14, %v1702_v13 }
 0x6cd   :  { %3354 = vmatprep.subr.bf16.mxu1 %v3830_v0 }
 0x6d0   :  { %3355 = vmatpush3.bf16.msra.mxu1 %v3577_v25 }
 0x6d1   :  { %3356 = vmatprep.subr.bf16.mxu1 %v3830_v0 }
 0x6d4   :  { %3357 = vmatpush3.bf16.msra.mxu1 %v3578_v26 }
 0x6d5   :  { %3358 = vmatprep.subr.bf16.mxu1 %v3830_v0 }
 0x6d8   :  { %3359 = vmatpush3.bf16.msra.mxu1 %v3579_v27 }
 0x6d9   :  { %3360 = vmatprep.subr.bf16.mxu1 %v3830_v0 }
 0x6dc   :  { %3361 = vmatpush3.bf16.msra.mxu1 %v3580_v28 }
 0x6dd   :  { %3362 = vmatprep.subr.bf16.mxu1 %v3830_v0 }
 0x6e0   :  { %3363 = vmatpush3.bf16.msra.mxu1 %v3581_v31  ;;  %v1707_v31 = vmul.f32 1.442695, %v4152_v24 }
 0x6e1   :  { %3364 = vmatprep.subr.bf16.mxu1 %v3830_v0 }
 0x6e4   :  { %3365 = vmatpush3.bf16.msra.mxu1 %v3582_v32 }
 0x6e5   :  { %3366 = vmatprep.subr.bf16.mxu1 %v3830_v0 }
 0x6e8   :  { %3367 = vmatpush3.bf16.msra.mxu1 %v3583_v33 }
 0x744   :  { %v2029_v25 = vpop.xlane.xlu0 %2028 }
 0x745   :  { %v4161_v32 = vsub.f32 %v4085_v2, %v2029_v25 }
 0x79d   :  { %v2348_v35 = vpop.f32.mrb[24].mxu1 }
 0x79e   :  { %v4104_v37 = vadd.f32 %v4062_v12, %v2348_v35  ;;  %v3350_v38 = vpop.f32.mrb[25].mxu1  ;;  %v3197_v39 = vpop.f32.mrb[28].mxu0 }
 0x79f   :  { %v2351_v40 = vpop.f32.mrb[26].mxu1  ;;  %v3198_v41 = vpop.f32.mrb[29].mxu0 }
 0x7a0   :  { %v4107_v42 = vadd.f32 %v4062_v12, %v2351_v40  ;;  %v3199_v43 = vadd.f32 %v3198_v41, %v3197_v39  ;;  %v3200_v44 = vpop.f32.mrb[30].mxu0  ;;  %2355 = vmax.xlane.f32.xlu0 %v4104_v37  ;;  %v3351_v45 = vpop.f32.mrb[27].mxu1  ;;  %v2034_v40 = vmul.f32 1.442695, %v4161_v32 }
 0x7a1   :  { %v3201_v48 = vpop.f32.mrb[31].mxu0 }
 0x7a2   :  { %v2560_v0 = vadd.f32 %v3199_v43, %v4040_v34  ;;  %v3202_v19 = vadd.f32 %v3201_v48, %v3200_v44  ;;  %2357 = vmax.xlane.f32.xlu1 %v4107_v42 }
 0x7a4   :  { %v2563_v49 = vadd.f32 %v3202_v19, %v4040_v34  ;;  %3612 = vtanh.f32 %v2560_v0  ;;  %v723_v34 = vpop.xlane.xlu1 %722 }
 0x7a5   :  { %v4125_v4 = vsub.f32 %v3999_v10, %v723_v34  ;;  %v4137_v10 = vsub.f32 %v4035_v29, %v1375_v30 }
 0x7a6   :  { %3614 = vtanh.f32 %v2563_v49 }
 0x7a7   :  { %3616 = vpow2.f32 %v400_v61  ;;  %v728_v7 = vmul.f32 1.442695, %v4125_v4  ;;  %v1380_v23 = vmul.f32 1.442695, %v4137_v10 }
 0x7a8   :  { %v1050_v5 = vpop.xlane.xlu1 %1049  ;;  %3618 = vpow2.f32 %v402_v3 }
 0x7a9   :  { %v4133_v1 = vsub.f32 %v4018_v52, %v1050_v5  ;;  %3620 = vpow2.f32 %v726_v21 }
 0x7aa   :  { %3622 = vpow2.f32 %v728_v7 }
 0x7ab   :  { %v1055_v16 = vmul.f32 1.442695, %v4133_v1  ;;  %3624 = vpow2.f32 %v1053_v9 }
 0x7ac   :  { %v1377_v8 = vpop.xlane.xlu1 %1376 }
 0x7ad   :  { %v4144_v17 = vsub.f32 %v4043_v36, %v1377_v8  ;;  %3626 = vpow2.f32 %v1055_v16 }
 0x7ae   :  { %v3613_v50 = vpop.eup %3612  ;;  %3628 = vpow2.f32 %v1380_v23 }
 0x7af   :  { %v1382_v36 = vmul.f32 1.442695, %v4144_v17 }
 0x7b0   :  { %v3615_v51 = vpop.eup %3614  ;;  %v1704_v18 = vpop.xlane.xlu1 %1703 }
 0x7b1   :  { %v2568_v53 = vpack.c.bf16 %v3615_v51, %v3613_v50  ;;  %v3617_v26 = vpop.eup %3616  ;;  %v4157_v27 = vsub.f32 %v4068_v20, %v1704_v18  ;;  %3630 = vpow2.f32 %v1382_v36 }
 0x7b2   :  { %v3619_v28 = vpop.eup %3618  ;;  %3632 = vpow2.f32 %v1707_v31 }
 0x7b3   :  { %3369 = vmatmul.mubr.bf16.vlgmr.msra.gmra.mrb[28].mxu1 %v2568_v53  ;;  %v2709_v54 = vunpack.c.l.bf16 %v2568_v53  ;;  %v2710_v55 = vunpack.c.h.bf16 %v2568_v53  ;;  %v3621_v33 = vpop.eup %3620  ;;  %v1709_v35 = vmul.f32 1.442695, %v4157_v27 }
 0x7b4   :  { %v3623_v39 = vpop.eup %3622 }
 0x7b5   :  { %2711 = vst [vmem:[#allocation12] sm:$0xff] %v2709_v54  ;;  %2712 = vst [vmem:[#allocation12 + $0x8] sm:$0xff] %v2710_v55  ;;  %v3625_v2 = vpop.eup %3624  ;;  %3634 = vpow2.f32 %v1709_v35 }
 0x7b6   :  { %3636 = vpow2.f32 %v2034_v40 }
 0x82d   :  { %v2356_v14 = vpop.xlane.xlu0 %2355 }
 0x82e   :  { %v4169_v41 = vsub.f32 %v4104_v37, %v2356_v14 }
 0x830   :  { %v2361_v45 = vmul.f32 1.442695, %v4169_v41 }
 0x886   :  { %v2675_v11 = vpop.f32.mrb[28].mxu1 }
 0x887   :  { %v4140_v15 = vadd.f32 %v4062_v12, %v2675_v11  ;;  %v3370_v46 = vpop.f32.mrb[29].mxu1 }
 0x888   :  { %v2678_v52 = vpop.f32.mrb[30].mxu1 }
 0x889   :  { %v4147_v22 = vadd.f32 %v4062_v12, %v2678_v52  ;;  %2682 = vmax.xlane.f32.xlu0 %v4140_v15  ;;  %v3371_v29 = vpop.f32.mrb[31].mxu1  ;;  %v2031_v12 = vpop.xlane.xlu1 %2030 }
 0x88a   :  { %v4165_v38 = vsub.f32 %v4088_v47, %v2031_v12  ;;  %v3627_v47 = vpop.eup %3626 }
 0x88b   :  { %2684 = vmax.xlane.f32.xlu1 %v4147_v22  ;;  %v3629_v48 = vpop.eup %3628 }
 0x88c   :  { %v2036_v43 = vmul.f32 1.442695, %v4165_v38  ;;  %v3631_v37 = vpop.eup %3630 }
 0x88d   :  { %404 = vadd.xlane.f32.xlu0 %v3617_v26  ;;  %v2358_v20 = vpop.xlane.xlu1 %2357  ;;  %v3633_v19 = vpop.eup %3632 }
 0x88e   :  { %v4173_v44 = vsub.f32 %v4107_v42, %v2358_v20  ;;  %3638 = vpow2.f32 %v2036_v43  ;;  %v3635_v49 = vpop.eup %3634 }
 0x88f   :  { %406 = vadd.xlane.f32.xlu1 %v3619_v28  ;;  %3640 = vpow2.f32 %v2361_v45  ;;  %v3637_v42 = vpop.eup %3636 }
 0x890   :  { %v2363_v0 = vmul.f32 1.442695, %v4173_v44 }
 0x891   :  { %730 = vadd.xlane.f32.xlu0 %v3621_v33 }
 0x892   :  { %3642 = vpow2.f32 %v2363_v0 }
 0x893   :  { %732 = vadd.xlane.f32.xlu1 %v3623_v39 }
 0x895   :  { %1057 = vadd.xlane.f32.xlu0 %v3625_v2 }
 0x897   :  { %1059 = vadd.xlane.f32.xlu1 %v3627_v47 }
 0x898   :  { %v3639_v50 = vpop.eup %3638 }
 0x899   :  { %1384 = vadd.xlane.f32.xlu0 %v3629_v48  ;;  %v3641_v51 = vpop.eup %3640 }
 0x89b   :  { %1386 = vadd.xlane.f32.xlu1 %v3631_v37 }
 0x89c   :  { %v3643_v53 = vpop.eup %3642 }
 0x89d   :  { %1711 = vadd.xlane.f32.xlu0 %v3633_v19 }
 0x89f   :  { %1713 = vadd.xlane.f32.xlu1 %v3635_v49 }
 0x8a1   :  { %2038 = vadd.xlane.f32.xlu0 %v3637_v42 }
 0x8a3   :  { %2040 = vadd.xlane.f32.xlu1 %v3639_v50 }
 0x8a5   :  { %2365 = vadd.xlane.f32.xlu0 %v3641_v51 }
 0x8a7   :  { %2367 = vadd.xlane.f32.xlu1 %v3643_v53 }
 0x916   :  { %v2683_v54 = vpop.xlane.xlu0 %2682 }
 0x917   :  { %v4178_v55 = vsub.f32 %v4140_v15, %v2683_v54 }
 0x918   :  { %v2685_v56 = vpop.xlane.xlu1 %2684 }
 0x919   :  { %v2688_v57 = vmul.f32 1.442695, %v4178_v55  ;;  %v4182_v58 = vsub.f32 %v4147_v22, %v2685_v56 }
 0x91a   :  { %v405_v34 = vpop.xlane.xlu0 %404 }
 0x91b   :  { %3644 = vpow2.f32 %v2688_v57  ;;  %v2690_v61 = vmul.f32 1.442695, %v4182_v58 }
 0x91c   :  { %3646 = vlog2.f32 %v405_v34  ;;  %v407_v63 = vpop.xlane.xlu1 %406 }
 0x91d   :  { %3648 = vpow2.f32 %v2690_v61 }
 0x91e   :  { %3650 = vlog2.f32 %v407_v63  ;;  %v731_v3 = vpop.xlane.xlu0 %730 }
 0x91f   :  { %3652 = vlog2.f32 %v731_v3 }
 0x920   :  { %v733_v5 = vpop.xlane.xlu1 %732 }
 0x921   :  { %3654 = vlog2.f32 %v733_v5 }
 0x922   :  { %v1058_v21 = vpop.xlane.xlu0 %1057 }
 0x923   :  { %3656 = vlog2.f32 %v1058_v21 }
 0x924   :  { %v1060_v30 = vpop.xlane.xlu1 %1059 }
 0x925   :  { %v3645_v7 = vpop.eup %3644  ;;  %3658 = vlog2.f32 %v1060_v30 }
 0x926   :  { %v3647_v8 = vpop.eup %3646  ;;  %2692 = vadd.xlane.f32.xlu0 %v3645_v7  ;;  %v1385_v9 = vpop.xlane.xlu0 %1384 }
 0x927   :  { %v3649_v11 = vpop.eup %3648  ;;  %v409_v13 = vmul.f32 0.6931472, %v3647_v8  ;;  %3660 = vlog2.f32 %v1385_v9 }
 0x928   :  { %v3651_v15 = vpop.eup %3650  ;;  %2694 = vadd.xlane.f32.xlu1 %v3649_v11  ;;  %v1387_v46 = vpop.xlane.xlu1 %1386 }
 0x929   :  { %v3653_v16 = vpop.eup %3652  ;;  %v412_v52 = vsub.f32 %v4114_v59, %v409_v13  ;;  %v411_v18 = vmul.f32 0.6931472, %v3651_v15  ;;  %3662 = vlog2.f32 %v1387_v46 }
 0x92a   :  { %v735_v22 = vmul.f32 0.6931472, %v3653_v16  ;;  %v1712_v29 = vpop.xlane.xlu0 %1711 }
 0x92b   :  { %v3655_v23 = vpop.eup %3654  ;;  %414 = vst [vmem:[#allocation11] sm:$0xff] %v412_v52  ;;  %v413_v25 = vsub.f32 %v4117_v60, %v411_v18  ;;  %3664 = vlog2.f32 %v1712_v29 }
 0x92c   :  { %v738_v26 = vsub.f32 %v4121_v62, %v735_v22  ;;  %v737_v36 = vmul.f32 0.6931472, %v3655_v23  ;;  %v1714_v12 = vpop.xlane.xlu1 %1713 }
 0x92d   :  { %v3657_v28 = vpop.eup %3656  ;;  %415 = vst [vmem:[#allocation11 + $0x8] sm:$0xff] %v413_v25  ;;  %3666 = vlog2.f32 %v1714_v12 }
 0x92e   :  { %741 = vst [vmem:[#allocation11 + $0x10] sm:$0xff] %v738_v26  ;;  %v739_v31 = vsub.f32 %v4125_v4, %v737_v36  ;;  %v1062_v59 = vmul.f32 0.6931472, %v3657_v28  ;;  %v2039_v14 = vpop.xlane.xlu0 %2038 }
 0x92f   :  { %v3659_v33 = vpop.eup %3658  ;;  %3668 = vlog2.f32 %v2039_v14 }
 0x930   :  { %742 = vst [vmem:[#allocation11 + $0x18] sm:$0xff] %v739_v31  ;;  %v1065_v35 = vsub.f32 %v4129_v6, %v1062_v59  ;;  %v1064_v20 = vmul.f32 0.6931472, %v3659_v33  ;;  %v2041_v60 = vpop.xlane.xlu1 %2040 }
 0x931   :  { %v3661_v39 = vpop.eup %3660  ;;  %3670 = vlog2.f32 %v2041_v60 }
 0x932   :  { %1068 = vst [vmem:[#allocation11 + $0x20] sm:$0xff] %v1065_v35  ;;  %v1066_v62 = vsub.f32 %v4133_v1, %v1064_v20  ;;  %v1389_v40 = vmul.f32 0.6931472, %v3661_v39  ;;  %v2366_v2 = vpop.xlane.xlu0 %2365 }
 0x933   :  { %v3663_v43 = vpop.eup %3662  ;;  %3672 = vlog2.f32 %v2366_v2 }
 0x934   :  { %1069 = vst [vmem:[#allocation11 + $0x28] sm:$0xff] %v1066_v62  ;;  %v1392_v4 = vsub.f32 %v4137_v10, %v1389_v40  ;;  %v1391_v47 = vmul.f32 0.6931472, %v3663_v43  ;;  %v2368_v45 = vpop.xlane.xlu1 %2367 }
 0x935   :  { %v3665_v48 = vpop.eup %3664  ;;  %3674 = vlog2.f32 %v2368_v45 }
 0x936   :  { %1395 = vst [vmem:[#allocation11 + $0x30] sm:$0xff] %v1392_v4  ;;  %v1393_v6 = vsub.f32 %v4144_v17, %v1391_v47  ;;  %v1716_v0 = vmul.f32 0.6931472, %v3665_v48 }
 0x937   :  { %v3667_v37 = vpop.eup %3666 }
 0x938   :  { %1396 = vst [vmem:[#allocation11 + $0x38] sm:$0xff] %v1393_v6  ;;  %v1719_v19 = vsub.f32 %v4152_v24, %v1716_v0  ;;  %v1718_v1 = vmul.f32 0.6931472, %v3667_v37 }
 0x939   :  { %v3669_v49 = vpop.eup %3668 }
 0x93a   :  { %1722 = vst [vmem:[#allocation11 + $0x40] sm:$0xff] %v1719_v19  ;;  %v1720_v42 = vsub.f32 %v4157_v27, %v1718_v1  ;;  %v2043_v50 = vmul.f32 0.6931472, %v3669_v49 }
 0x93b   :  { %v3671_v51 = vpop.eup %3670 }
 0x93c   :  { %1723 = vst [vmem:[#allocation11 + $0x48] sm:$0xff] %v1720_v42  ;;  %v2046_v10 = vsub.f32 %v4161_v32, %v2043_v50  ;;  %v2045_v53 = vmul.f32 0.6931472, %v3671_v51 }
 0x93d   :  { %v3673_v54 = vpop.eup %3672 }
 0x93e   :  { %2049 = vst [vmem:[#allocation11 + $0x50] sm:$0xff] %v2046_v10  ;;  %v2047_v17 = vsub.f32 %v4165_v38, %v2045_v53  ;;  %v2370_v56 = vmul.f32 0.6931472, %v3673_v54 }
 0x93f   :  { %v3675_v57 = vpop.eup %3674 }
 0x940   :  { %2050 = vst [vmem:[#allocation11 + $0x58] sm:$0xff] %v2047_v17  ;;  %v2373_v24 = vsub.f32 %v4169_v41, %v2370_v56  ;;  %v2372_v34 = vmul.f32 0.6931472, %v3675_v57 }
 0x942   :  { %2376 = vst [vmem:[#allocation11 + $0x60] sm:$0xff] %v2373_v24  ;;  %v2374_v61 = vsub.f32 %v4173_v44, %v2372_v34 }
 0x944   :  { %2377 = vst [vmem:[#allocation11 + $0x68] sm:$0xff] %v2374_v61 }
 0x945   :  { %3779 = shalt.err (!%p3776_p8)
}
 0x946   :  { %s3780_s18 = scalar_lea.hbm %s4238_s7, 256 }
 0x947   :  { %p3781_p9 = scmp.ne.s32.totalorder %s4238_s7, %s3780_s18  ;;  %p3784_p10 = scmp.lt.u32.totalorder %s3780_s18, %s4238_s7 }
 0x949   :  { %p3786_p11 = pnand %p3784_p10, %p3781_p9 }
 0x94b   :  { %3789 = shalt.err (!%p3786_p11)
}
 0x94c   :  { %2736 = dma.vmem_to_hbm [thread:$0]  %s2731_s13, 256, %s4238_s7, [#allocation13], %s3823_s11, %s3823_s11, %s3824_s12  }
 0x94d   :  { %s3833_s23 = smov [#allocation11]  }
 0x94e   :  { %s2718_s24 = sshll.u32 %s3833_s23, 4  ;;  %s2719_s24 = int_to_ptr.vmem [resolvable:$true] %s2718_s24 }
 0x94f   :  { %s3790_s26 = scalar_lea.vmem %s2719_s24, 2048  ;;  %p3795_p13 = scmp.lt.s32.totalorder %s2719_s24, %s2719_s24 }
 0x950   :  { %p3791_p12 = scmp.ne.s32.totalorder %s2719_s24, %s3790_s26  ;;  %p3796_p0 = scmp.lt.s32.totalorder %s3790_s26, %s3790_s26 }
 0x952   :  { %p3797_p1 = por %p3796_p0, %p3795_p13 }
 0x954   :  { %p3798_p2 = pnand %p3797_p1, %p3791_p12 }
 0x9b3   :  { %v2693_v27 = vpop.xlane.xlu0 %2692 }
 0x9b4   :  { %3676 = vlog2.f32 %v2693_v27 }
 0x9b5   :  { %v2695_v32 = vpop.xlane.xlu1 %2694 }
 0x9b6   :  { %3678 = vlog2.f32 %v2695_v32 }
 0x9be   :  { %v3677_v38 = vpop.eup %3676 }
 0x9bf   :  { %v2697_v41 = vmul.f32 0.6931472, %v3677_v38 }
 0x9c0   :  { %v3679_v44 = vpop.eup %3678 }
 0x9c1   :  { %v2700_v63 = vsub.f32 %v4178_v55, %v2697_v41  ;;  %v2699_v3 = vmul.f32 0.6931472, %v3679_v44 }
 0x9c3   :  { %2703 = vst [vmem:[#allocation11 + $0x70] sm:$0xff] %v2700_v63  ;;  %v2701_v5 = vsub.f32 %v4182_v58, %v2699_v3 }
 0x9c5   :  { %2704 = vst [vmem:[#allocation11 + $0x78] sm:$0xff] %v2701_v5 }
 0x9c6   :  { %3801 = shalt.err (!%p3798_p2)
}
 0x9c7   :  { %s3802_s28 = scalar_lea.hbm %s4237_s6, 2048 }
 0x9c8   :  { %p3803_p3 = scmp.ne.s32.totalorder %s4237_s6, %s3802_s28  ;;  %p3806_p4 = scmp.lt.u32.totalorder %s3802_s28, %s4237_s6 }
 0x9ca   :  { %p3808_p5 = pnand %p3806_p4, %p3803_p3 }
 0x9cc   :  { %3811 = shalt.err (!%p3808_p5)
}
 0x9cd   :  { %2724 = dma.vmem_to_hbm [thread:$0]  %s2719_s24, 2048, %s4237_s6, [#allocation5], %s3823_s11, %s3823_s11, %s3824_s12  }
 0x9ce   :  { %3818 = dma.done.wait [#allocation5], 2048  }
 0x9cf   :  { %3819 = vsyncadd [#allocation5], 4294965248 }
 0x9d0   :  { %3820 = dma.done.wait [#allocation13], 256  }
 0x9d1   :  { %3821 = vsyncadd [#allocation13], 4294967040 }
 0x9d2   :  { %2743 = vsyncpa [#allocation4], 1 }
 0x9d3   :  { %2744 = vsyncpa [#allocation7], 1 }
 0x9d4   :  { %2745 = vsyncpa [#allocation10], 1 }
 0x9d5   :  { %2746 = vsyncpa [#allocation5], 1 }
 0x9d6   :  { %2747 = vsyncpa [#allocation13], 1 }

</bundles_post_ra>
